<compile_context>
chip_gen: v7x
topology: tpu7x:2x2x1
jax: 0.10.0
libtpu: 0.0.40
codegen_flags: <defaults>
</compile_context>

<pallas_src>
import functools

import jax
import jax.numpy as jnp
from jax.experimental import pallas as pl
from jax.experimental.pallas import tpu as pltpu

NUM_CLASSES = 10
IN_FEATURES = 3 * 128 * 128  # 49152
N_CORES = 2                  # K-reduction split (v7x megacore); fine on 1-TC chips


def _linear_kernel(x_ref, w_ref, o_ref):
    """Accumulate one K-tile of x @ W directly into the resident output block."""
    k = pl.program_id(1)  # reduction (innermost) axis

    @pl.when(k == 0)
    def _():
        o_ref[...] = jnp.zeros_like(o_ref)

    # x tile: (B, tk) f32; W tile: (tk, 10) bf16 upcast to f32; fp32 accumulation.
    o_ref[...] += jnp.dot(
        x_ref[...],
        w_ref[...].astype(jnp.float32),
        preferred_element_type=jnp.float32,
    )[None]


@functools.partial(jax.jit, static_argnames=("tk",))
def one_layer_mlp(x_nchw, w_kn, b_n, *, tk=8192):
    """x_nchw: [B,3,128,128] f32, w_kn: [K, 10] bf16, b_n: [10] f32 -> [B, 10] f32."""
    B = x_nchw.shape[0]
    x2d = x_nchw.reshape(B, IN_FEATURES)  # same flattening order as torch .view
    K = IN_FEATURES
    assert K % N_CORES == 0 and (K // N_CORES) % tk == 0, "tk must evenly tile K/N_CORES"
    nk = (K // N_CORES) // tk  # K-steps per core

    partials = pl.pallas_call(
        _linear_kernel,
        out_shape=jax.ShapeDtypeStruct((N_CORES, B, NUM_CLASSES), jnp.float32),
        grid_spec=pltpu.PrefetchScalarGridSpec(
            num_scalar_prefetch=0,
            grid=(N_CORES, nk),  # (core split, K reduction)
            in_specs=[
                # x tile: full batch kept as the MXU M dim in one block.
                pl.BlockSpec((B, tk), lambda c, k: (0, c * nk + k)),
                # W tile: unpadded [tk, 10]; last dim == full array dim.
                pl.BlockSpec((tk, NUM_CLASSES), lambda c, k: (c * nk + k, 0)),
            ],
            # Same output block for every k -> VMEM-resident accumulator (no scratch).
            out_specs=pl.BlockSpec((1, B, NUM_CLASSES), lambda c, k: (c, 0, 0)),
        ),
        compiler_params=pltpu.CompilerParams(
            dimension_semantics=("parallel", "arbitrary"),
            vmem_limit_bytes=64 << 20,  # headroom for the lane-padded W buffers
        ),
    )(x2d, w_kn)

    # Combine the per-core partial sums and add the bias (tiny epilogue in XLA).
    return partials.sum(axis=0) + b_n


def init_params(key):
    """Deterministic init matching nn.Linear shapes (uniform ~ 1/sqrt(fan_in))."""
    kw, kb = jax.random.split(key)
    bound = 1.0 / jnp.sqrt(float(IN_FEATURES))
    # torch weight is [N, K]; kernel uses transposed [K, N], unpadded, bf16-streamed.
    w_nk = jax.random.uniform(
        kw, (NUM_CLASSES, IN_FEATURES), jnp.float32, -bound, bound
    )
    b = jax.random.uniform(kb, (NUM_CLASSES,), jnp.float32, -bound, bound)
    w_kn = w_nk.T.astype(jnp.bfloat16)
    return w_kn, b, w_nk


if __name__ == "__main__":
    key = jax.random.PRNGKey(0)
    kx, kp = jax.random.split(key)

    # Small batch; the feature dim is fixed by the module (3*128*128).
    B = 2
    x = jax.random.normal(kx, (B, 3, 128, 128), jnp.float32)

    w_kn, b, w_nk = init_params(kp)

    y = one_layer_mlp(x, w_kn, b)
    jax.block_until_ready(y)

    # Pure-JAX fp32 reference; tolerance loosened slightly for bf16 weight storage
    # (accumulation itself is fp32).
    y_ref = x.reshape(B, IN_FEATURES) @ w_nk.T + b
    assert y.shape == (B, NUM_CLASSES)
    max_err = float(jnp.max(jnp.abs(y - y_ref)))
    assert jnp.allclose(y, y_ref, atol=3e-2, rtol=3e-2), max_err

    print("KERNEL_OK")
</pallas_src>

<mosaic_0001>
module attributes {stable_mosaic.version = 11 : i64} {
  func.func @_linear_kernel(%arg0: i32, %arg1: i32, %arg2: memref<2x8192xf32, #tpu.memory_space<vmem>>, %arg3: memref<8192x10xbf16, #tpu.memory_space<vmem>>, %arg4: memref<1x2x10xf32, #tpu.memory_space<vmem>>) attributes {dimension_semantics = [#tpu.dimension_semantics<parallel>, #tpu.dimension_semantics<arbitrary>], iteration_bounds = array<i64: 2, 3>, scalar_prefetch = 0 : i64, scratch_operands = 0 : i64, tpu.core_type = #tpu.core_type<tc>, window_params = [{transform_indices = @transform_0, window_bounds = array<i64: 2, 8192>}, {transform_indices = @transform_1, window_bounds = array<i64: 8192, 10>}, {transform_indices = @transform_2, window_bounds = array<i64: 1, 2, 10>}]} {
    %c0_i32 = arith.constant 0 : i32
    %0 = arith.cmpi eq, %arg1, %c0_i32 : i32
    %1 = arith.extui %0 : i1 to i32
    %c0_i32_0 = arith.constant 0 : i32
    %2 = arith.cmpi ne, %1, %c0_i32_0 : i32
    scf.if %2 {
      %cst_10 = arith.constant 0.000000e+00 : f32
      %11 = vector.broadcast %cst_10 : f32 to vector<1x2x10xf32>
      %c0_11 = arith.constant 0 : index
      %c0_12 = arith.constant 0 : index
      %c0_13 = arith.constant 0 : index
      %12 = vector.load %arg4[%c0_11, %c0_12, %c0_13] : memref<1x2x10xf32, #tpu.memory_space<vmem>>, vector<1x2x10xf32>
      tpu.vector_store %arg4[%c0_11, %c0_12, %c0_13], %11 {strides = array<i32>} : memref<1x2x10xf32, #tpu.memory_space<vmem>>, vector<1x2x10xf32>,
    } else {
    }
    %c0 = arith.constant 0 : index
    %c0_1 = arith.constant 0 : index
    %c0_2 = arith.constant 0 : index
    %3 = vector.load %arg4[%c0, %c0_1, %c0_2] : memref<1x2x10xf32, #tpu.memory_space<vmem>>, vector<1x2x10xf32>
    %c0_3 = arith.constant 0 : index
    %c0_4 = arith.constant 0 : index
    %4 = vector.load %arg2[%c0_3, %c0_4] : memref<2x8192xf32, #tpu.memory_space<vmem>>, vector<2x8192xf32>
    %c0_5 = arith.constant 0 : index
    %c0_6 = arith.constant 0 : index
    %5 = vector.load %arg3[%c0_5, %c0_6] : memref<8192x10xbf16, #tpu.memory_space<vmem>>, vector<8192x10xbf16>
    %6 = arith.extf %5 : vector<8192x10xbf16> to vector<8192x10xf32>
    %cst = arith.constant dense<0.000000e+00> : vector<2x10xf32>
    %7 = tpu.matmul %4, %6, %cst {dimension_numbers = #tpu.dot_dimension_numbers<[1], [0], [0], [1], [0, 0, 1, 1], [], []>} : vector<2x8192xf32>, vector<8192x10xf32>, vector<2x10xf32> -> vector<2x10xf32>
    %8 = vector.shape_cast %7 : vector<2x10xf32> to vector<1x2x10xf32>
    %9 = arith.addf %3, %8 : vector<1x2x10xf32>
    %c0_7 = arith.constant 0 : index
    %c0_8 = arith.constant 0 : index
    %c0_9 = arith.constant 0 : index
    %10 = vector.load %arg4[%c0_7, %c0_8, %c0_9] : memref<1x2x10xf32, #tpu.memory_space<vmem>>, vector<1x2x10xf32>
    tpu.vector_store %arg4[%c0_7, %c0_8, %c0_9], %9 {strides = array<i32>} : memref<1x2x10xf32, #tpu.memory_space<vmem>>, vector<1x2x10xf32>,
    return
  }
  func.func @transform_0(%arg0: i32, %arg1: i32) -> (i32, i32) {
    %c3_i32 = arith.constant 3 : i32
    %0 = arith.muli %arg0, %c3_i32 : i32
    %1 = arith.addi %0, %arg1 : i32
    %c0_i32 = arith.constant 0 : i32
    %c0_i32_0 = arith.constant 0 : i32
    return %c0_i32, %1 : i32, i32
  }
  func.func @transform_1(%arg0: i32, %arg1: i32) -> (i32, i32) {
    %c3_i32 = arith.constant 3 : i32
    %0 = arith.muli %arg0, %c3_i32 : i32
    %1 = arith.addi %0, %arg1 : i32
    %c0_i32 = arith.constant 0 : i32
    %c0_i32_0 = arith.constant 0 : i32
    return %1, %c0_i32 : i32, i32
  }
  func.func @transform_2(%arg0: i32, %arg1: i32) -> (i32, i32, i32) {
    %c0_i32 = arith.constant 0 : i32
    %c0_i32_0 = arith.constant 0 : i32
    %c0_i32_1 = arith.constant 0 : i32
    return %arg0, %c0_i32, %c0_i32_0 : i32, i32, i32
  }
}

</mosaic_0001>

<bundles_post_ra>
// kernel: one_layer_mlp.1
= control target key start
LH: loop header
LB: loop body
LE: loop exit
PB: predicated region body
PF: predicated region fallthrough
CT: control target
= control target key end

     0   :  { %s11103_s0 = inlined_call_operand.hbm [shape: f32[2,49152], index: 0, kind: input, shape index: {}]   ;;  %s11104_s1 = inlined_call_operand.hbm [shape: bf16[49152,10], index: 1, kind: input, shape index: {}]   ;;  %s11105_s2 = inlined_call_operand.hbm [shape: f32[2,2,10], index: 2, kind: output, shape index: {}]  }
   0x1   :  { %11110 = sst [smem:[#allocation13_spill]] %s11103_s0 }
   0x2   :  { %7 = vsyncpa [#allocation3], 0 }
   0x3   :  { %9 = vsyncpa [#allocation3 + $0x1], 0 }
   0x4   :  { %10 = vsyncpa [#allocation6], 0 }
   0x5   :  { %12 = vsyncpa [#allocation6 + $0x1], 0 }
   0x6   :  { %13 = vsyncpa [#allocation4], 0 }
   0x7   :  { %15 = vsyncpa [#allocation4 + $0x1], 0  ;;  %s10079_s9 = smov 0   ;;  %s10081_s10 = smov 0  }
   0x8   :  { %s10083_s11 = smov 0   ;;  %s10085_s12 = smov 0  }
   0x9   :  { %s10087_s13 = smov 0   ;;  %s10089_s14 = smov 0  }
   0xa   :  { %s10091_s15 = smov 0   ;;  %s10093_s16 = smov 0  }
   0xb   :  { %s10095_s17 = smov 0   ;;  %s10097_s18 = smov 0  }
   0xc   :  { %s10099_s19 = smov 0  }
   0xd LB: > { %s5018_s20 = sadd.s32 4294967295, %s10055_s19   ;;  %s5019_s21 = sadd.s32 4294967294, %s10055_s19   ;;  %s10055_s19 = sphi %s10099_s19, %s21_s19   ;;  %s10051_s18 = sphi %s10097_s18, %s11136_s18   ;;  %s10047_s17 = sphi %s10095_s17, %s11135_s17   ;;  %s10043_s16 = sphi %s10093_s16, %s11134_s16   ;;  %s10039_s15 = sphi %s10091_s15, %s11133_s15   ;;  %s10035_s14 = sphi %s10089_s14, %s11132_s14   ;;  %s10031_s13 = sphi %s10087_s13, %s11131_s13   ;;  %s10027_s12 = sphi %s10085_s12, %s11130_s12   ;;  %s10023_s11 = sphi %s10083_s11, %s11129_s11   ;;  %s10019_s10 = sphi %s10081_s10, %s11128_s10   ;;  %s10015_s9 = sphi %s10079_s9, %s11127_s9  }
   0xe   : > { %s30_s22 = sadd.s32 1, %s10047_s17  ;;  %s33_s23 = sadd.s32 1, %s10051_s18 }
   0xf   : > { %p31_p0 = scmp.ge.s32.totalorder %s30_s22, 3  ;;  %s37_s24 = smul.u32 3, %s10051_s18 }
  0x10   : > { %s44_s25 = sadd.s32 1, %s10035_s14  ;;  %p51_p1 = scmp.ne.s32.totalorder %s10035_s14, %s10031_s13 }
  0x11   : > { %s11138_s22 = smov (%p31_p0, %s30_s22), 0  ;;  %s11140_s23 = smov (!%p31_p0, %s33_s23), %s10051_s18 }
  0x12   : > { %11111 = sst [smem:[#allocation11_spill]] %s11138_s22  ;;  %s10144_s26 = sadd.s32 %s10047_s17, %s37_s24 }
  0x13   : > { %p52_p2 = scmp.eq.s32.totalorder %s10055_s19, 0  ;;  %p35_p3 = scmp.ge.s32.totalorder %s11140_s23, 2 }
  0x14   : > { %p57_p4 = scmp.ne.s32.totalorder %s10031_s13, %s10027_s12  ;;  %p58_p6 = scmp.eq.s32.totalorder %s5018_s20, 0 }
  0x15   : > { %p10148_p5 = por %p52_p2, %p51_p1  ;;  %s11142_s23 = smov (%p35_p3, %s11140_s23), 0 }
  0x16   : > { %11113 = sst [smem:[#allocation12_spill]] %s11142_s23  ;;  %p10154_p7 = por %p58_p6, %p57_p4 }
  0x17   : > { %s100_s29 = sadd.s32 1, %s10023_s11  ;;  %s39_s30 = smul.u32 3, %s11142_s23 }
  0x18   : > { %s11114_s28 = scalar_select %p10154_p7, 1, 0 }
  0x19   : > { %s97_s3 = ssub.s32 %s10051_s18, %s11142_s23  ;;  %p110_p9 = scmp.ne.s32.totalorder %s10023_s11, %s10019_s10 }
  0x1a   : > { %p98_p8 = scmp.eq.s32.totalorder %s97_s3, 0  ;;  %s40_s4 = sadd.s32 %s39_s30, %s11138_s22 }
  0x1b   : > { %p111_p10 = scmp.eq.s32.totalorder %s5018_s20, 5  ;;  %s41_s5 = ssub.s32 %s10144_s26, %s40_s4 }
  0x1c   : > { %p116_p11 = scmp.ne.s32.totalorder %s10019_s10, %s10015_s9  ;;  %p42_p12 = scmp.eq.s32.totalorder %s41_s5, 0 }
  0x1d   : > { %p10168_p13 = por %p111_p10, %p110_p9  ;;  %p117_p0 = scmp.eq.s32.totalorder %s5019_s21, 5 }
  0x1e   : > { %s10173_s7 = scalar_select %p98_p8, %s10023_s11, %s100_s29  }
  0x1f   : > { %s11115_s6 = scalar_select %p10168_p13, 1, 0 }
  0x20   : > { %s10176_s8 = scalar_select %p42_p12, %s10035_s14, %s44_s25  }
  0x21   : > { %p9759_p1 = scmp.lt.s32.totalorder %s10055_s19, 6  ;;  %s10182_s12 = sand.u32 1, %s10035_s14  }
  0x22   : > { %p10184_p2 = por %p117_p0, %p116_p11  ;;  %s5022_s24 = sshll.u32 %s10182_s12, 7 }
  0x23   : > { %s5037_s30 = sshll.u32 %s10144_s26, 11  ;;  %s11117_s0 = sld [smem:[#allocation13_spill]] }
  0x24   : > { %s11116_s20 = scalar_select %p10184_p2, 1, 0 }
  0x25   : > { %s141_s21 = scalar_lea.vmem [#allocation2], %s5022_s24  ;;  %p10197_p3 = pnand %p9759_p1, %p10148_p5 }
  0x26   : > { %s151_s25 = sshll.u32 %s141_s21, 4  ;;  %s138_s3 = scalar_lea.sflag [#allocation3], %s10182_s12  ;;  %s10201_s25 = int_to_ptr.vmem [resolvable:$true] %s151_s25 }
  0x27   : > { %p9871_p8 = pneg %p10197_p3 }
  0x29   : > { %s10193_s29 = scalar_lea.hbm %s11117_s0, %s5037_s30  ;;  %s9874_s4 = scalar_lea.hbm %s11117_s0, 12288 }
  0x2a   : > { %s9869_s30 = scalar_lea.hbm %s10193_s29, 2048  ;;  %p9875_p5 = scmp.lt.u32.totalorder %s10193_s29, %s11117_s0 }
  0x2b   : > { %p9870_p6 = scmp.ne.s32.totalorder %s10193_s29, %s9869_s30  ;;  %p9876_p11 = scmp.lt.u32.totalorder %s9874_s4, %s9869_s30 }
  0x2c   : > { %p9878_p0 = scmp.lt.u32.totalorder %s9869_s30, %s10193_s29 }
  0x2d   : > { %p9872_p9 = pnand %p9871_p8, %p9870_p6  ;;  %p9877_p12 = por %p9876_p11, %p9875_p5 }
  0x2f   : > { %p9873_p10 = pneg %p9872_p9  ;;  %p9879_p1 = por %p9878_p0, %p9877_p12 }
  0x31   : > { %p9880_p4 = pnand %p9879_p1, %p9873_p10 }
  0x33   : > { %9883 = shalt.err (!%p9880_p4)
}
  0x34   : > { %s9884_s23 = scalar_lea.vmem %s10201_s25, 2048  ;;  %s10057_s27 = smov [#allocation2]  }
  0x35   : > { %p9885_p6 = scmp.ne.s32.totalorder %s10201_s25, %s9884_s23  ;;  %s9889_s24 = sshll.u32 %s10057_s27, 4  ;;  %s9890_s24 = int_to_ptr.vmem [resolvable:$false] %s9889_s24 }
  0x36   : > { %s9891_s22 = scalar_lea.vmem %s9890_s24, 4096  ;;  %p9892_p13 = scmp.lt.s32.totalorder %s10201_s25, %s9890_s24 }
  0x37   : > { %p9887_p9 = pnand %p9885_p6, %p9871_p8  ;;  %p9893_p5 = scmp.lt.s32.totalorder %s9891_s22, %s9884_s23 }
  0x39   : > { %p9888_p2 = pneg %p9887_p9  ;;  %p9894_p11 = por %p9893_p5, %p9892_p13 }
  0x3b   : > { %p9895_p12 = pnand %p9894_p11, %p9888_p2 }
  0x3d   : > { %9898 = shalt.err (!%p9895_p12)
}
  0x3e   : > { %9751 = dma.hbm_to_vmem [thread:$0]  (!%p10197_p3), %s10193_s29, 2048, %s10201_s25, %s138_s3  }
  0x3f   : > { %p179_p4 = scmp.lt.s32.totalorder %s10055_s19, 7  ;;  %s5025_s30 = sshll.u32 %s10182_s12, 12 }
  0x40   : > { %s11119_s4 = sshll.u32 %s10144_s26, 16  ;;  %p11120_p13 = scmp.ge.s32.totalorder %s10055_s19, 1 }
  0x41   : > { %s10238_s23 = scalar_lea.hbm %s11104_s1, %s11119_s4  ;;  %s162_s22 = scalar_lea.vmem [#allocation5], %s5025_s30 }
  0x42   : > { %p10242_p2 = pnand %p11120_p13, %p179_p4  ;;  %s171_s0 = sshll.u32 %s162_s22, 4  ;;  %s10246_s0 = int_to_ptr.vmem [resolvable:$true] %s171_s0 }
  0x43   : > { %s159_s29 = scalar_lea.sflag [#allocation6], %s10182_s12  ;;  %s9899_s26 = scalar_lea.hbm %s10238_s23, 65536 }
  0x44   : > { %p9900_p10 = scmp.ne.s32.totalorder %s10238_s23, %s9899_s26  ;;  %s9904_s4 = scalar_lea.hbm %s11104_s1, 393216 }
  0x45   : > { %p9905_p6 = scmp.lt.u32.totalorder %s10238_s23, %s11104_s1  ;;  %p9906_p9 = scmp.lt.u32.totalorder %s9904_s4, %s9899_s26 }
  0x46   : > { %p9902_p0 = pnand %p9900_p10, %p9871_p8  ;;  %p9908_p11 = scmp.lt.u32.totalorder %s9899_s26, %s10238_s23 }
  0x47   : > { %p9907_p5 = por %p9906_p9, %p9905_p6 }
  0x48   : > { %p9903_p1 = pneg %p9902_p0 }
  0x49   : > { %p9909_p12 = por %p9908_p11, %p9907_p5 }
  0x4b   : > { %p9910_p4 = pnand %p9909_p12, %p9903_p1 }
  0x4d   : > { %9913 = shalt.err (!%p9910_p4)
}
  0x4e   : > { %s9914_s30 = scalar_lea.vmem %s10246_s0, 65536  ;;  %s10058_s22 = smov [#allocation5]  }
  0x4f   : > { %p9915_p13 = scmp.ne.s32.totalorder %s10246_s0, %s9914_s30  ;;  %s9919_s25 = sshll.u32 %s10058_s22, 4  ;;  %s9920_s25 = int_to_ptr.vmem [resolvable:$false] %s9919_s25 }
  0x50   : > { %s9921_s3 = scalar_lea.vmem %s9920_s25, 131072  ;;  %p9922_p7 = scmp.lt.s32.totalorder %s10246_s0, %s9920_s25 }
  0x51   : > { %p9917_p10 = pnand %p9915_p13, %p9871_p8  ;;  %p9923_p6 = scmp.lt.s32.totalorder %s9921_s3, %s9914_s30 }
  0x53   : > { %p9918_p0 = pneg %p9917_p10  ;;  %p9924_p9 = por %p9923_p6, %p9922_p7 }
  0x55   : > { %p9925_p5 = pnand %p9924_p9, %p9918_p0 }
  0x57   : > { %9928 = shalt.err (!%p9925_p5)
}
  0x58   : > { %s10059_s26 = smov 64   ;;  %s10060_s4 = smov 4  }
  0x59   : > { %9754 = dma.hbm_to_vmem [thread:$0]  (!%p10197_p3), %s10238_s23, 65536, %s10246_s0, %s159_s29, %s10059_s26, %s10059_s26, %s10060_s4  }
  0x5a   : > { %183 = sbr.rel (%p10242_p2) target bundleno = 859 (0x35b), region = 28  ;;  %s185_s21 = sand.u32 (!%p10242_p2), 1, %s10031_s13  }
  0x5b   : > { %s5029_s27 = sshll.u32 (!%p10242_p2), %s185_s21, 7  ;;  %s186_s30 = scalar_lea.sflag (!%p10242_p2), [#allocation3], %s185_s21 }
  0x5c   : > { %s10277_s22 = scalar_lea.vmem (!%p10242_p2), [#allocation2], %s5029_s27  ;;  %p11122_p7 = scmp.ne.s32.totalorder (!%p10242_p2), %s11114_s28, 0 }
  0x61   : > { %10002 = dma.done.wait (%p11122_p7), %s186_s30, 2048  }
  0x62   : > { %10004 = vsyncadd (%p11122_p7), %s186_s30, 4294965248  ;;  %s5030_s25 = sshll.u32 %s185_s21, 12  ;;  %s195_s5 = scalar_lea.sflag [#allocation6], %s185_s21 }
  0x63   : > { %s10283_s12 = scalar_lea.vmem [#allocation5], %s5030_s25 }
  0x64   : > { %10006 = dma.done.wait (%p11122_p7), %s195_s5, 65536  }
  0x65   : > { %10008 = vsyncadd (%p11122_p7), %s195_s5, 4294901760  ;;  %s221_s0 = sand.u32 1, %s10019_s10   ;;  %p5032_p3 = scmp.ne.s32.totalorder %s10039_s15, 0 }
  0x66   : > { %s5031_s23 = sshll.u32 %s221_s0, 1  ;;  %vm234_vm0 = vcmask (!%p5032_p3), 74752   ;;  %v10061_v0 = vmov (!%p5032_p3), 0.0  }
  0x67   : > { %s10292_s24 = scalar_lea.vmem [#allocation7], %s5031_s23  ;;  %233 = sbr.rel (%p5032_p3) target bundleno = 110 (0x6e), region = 40 }
  0x68   : > { %235 = vst.msk [vmem:[%s10292_s24] sm:$0x3] (!%p5032_p3), %vm234_vm0, %v10061_v0 }
  0x6e PF: > { %v7094_v1 = vld [vmem:[%s10283_s12 + $0x40] sm:$0xff]   ;;  %v2321_v4 = vlaneseq  ;;  %v7095_v6 = vld [vmem:[%s10283_s12 + $0x48] sm:$0xff]   ;;  %v10062_v8 = vmov 1983009808   ;;  %v7096_v14 = vld [vmem:[%s10283_s12 + $0x50] sm:$0xff]   ;;  %s5034_s15 = sshll.u32 %s10043_s16, 5 }
  0x6f   : > { %v7110_v2 = vld [vmem:[%s10283_s12 + $0xc0] sm:$0xff]   ;;  %8719 = vmatprep.subr.bf16.mxu0 %v7094_v1  ;;  %v7111_v7 = vld [vmem:[%s10283_s12 + $0xc8] sm:$0xff]   ;;  %v2319_v9 = vunpack.c.l.s4 %v10062_v8  ;;  %v7112_v15 = vld [vmem:[%s10283_s12 + $0xd0] sm:$0xff]   ;;  %s4910_s28 = sshll.u32 %s10292_s24, 4  ;;  %vm4894_vm1 = vcmask 74752   ;;  %s11038_s26 = scalar_lea.hbm %s11105_s2, %s5034_s15  ;;  %s11040_s28 = int_to_ptr.vmem [resolvable:$true] %s4910_s28 }
  0x70   : > { %v5040_v3 = vld [vmem:[%s10283_s12] sm:$0xff]   ;;  %8751 = vmatprep.subr.bf16.mxu1 %v7110_v2  ;;  %v7087_v10 = vld [vmem:[%s10283_s12 + $0x8] sm:$0xff]   ;;  %v2322_v13 = vshrl.u32 %v2321_v4, 7  ;;  %v7088_v16 = vld [vmem:[%s10283_s12 + $0x10] sm:$0xff]   ;;  %s4897_s4 = scalar_lea.sflag [#allocation4], %s221_s0  ;;  %s9929_s21 = scalar_lea.vmem %s11040_s28, 32 }
  0x71   : > { %v7102_v5 = vld [vmem:[%s10283_s12 + $0x80] sm:$0xff]   ;;  %8721 = vmatpush3.bf16.msra.mxu0 %v5040_v3  ;;  %v7103_v11 = vld [vmem:[%s10283_s12 + $0x88] sm:$0xff]   ;;  %v2320_v12 = vunpack.c.0.s8 %v2319_v9  ;;  %v7104_v17 = vld [vmem:[%s10283_s12 + $0x90] sm:$0xff]   ;;  %p9930_p8 = scmp.ne.s32.totalorder %s11040_s28, %s9929_s21  ;;  %p11123_p2 = scmp.ne.s32.totalorder %s11115_s6, 0 }
  0x72   : > { %8753 = vmatpush3.bf16.msra.mxu1 %v7102_v5  ;;  %8723 = vmatprep.subr.bf16.mxu0 %v7095_v6  ;;  %v7097_v19 = vld [vmem:[%s10283_s12 + $0x58] sm:$0xff]   ;;  %v237_v21 = vld [vmem:[%s10277_s22] sm:$0xff]  ;;  %v7099_v33 = vld [vmem:[%s10283_s12 + $0x68] sm:$0xff]   ;;  %s10063_s16 = smov [#allocation7]  }
  0x73   : > { %8755 = vmatprep.subr.bf16.mxu1 %v7111_v7  ;;  %v10308_v18 = vsub.s32 %v2320_v12, %v2322_v13  ;;  %v7113_v20 = vld [vmem:[%s10283_s12 + $0xd8] sm:$0xff]   ;;  %v2317_v25 = vcombine.high %v237_v21, %v237_v21  ;;  %v7098_v26 = vld [vmem:[%s10283_s12 + $0x60] sm:$0xff]   ;;  %v7115_v34 = vld [vmem:[%s10283_s12 + $0xe8] sm:$0xff]   ;;  %p9931_p1 = pnand %p9930_p8, %p11123_p2  ;;  %s9933_s27 = sshll.u32 %s10063_s16, 4  ;;  %s9934_s27 = int_to_ptr.vmem [resolvable:$false] %s9933_s27 }
  0x74   : > { %v7089_v22 = vld [vmem:[%s10283_s12 + $0x18] sm:$0xff]   ;;  %v7114_v27 = vld [vmem:[%s10283_s12 + $0xe0] sm:$0xff]   ;;  %v7091_v35 = vld [vmem:[%s10283_s12 + $0x28] sm:$0xff]   ;;  %s9935_s30 = scalar_lea.vmem %s9934_s27, 64  ;;  %p9936_p12 = scmp.lt.s32.totalorder %s11040_s28, %s9934_s27 }
  0x75   : > { %8725 = vmatpush3.bf16.msra.mxu0 %v7087_v10  ;;  %v7105_v23 = vld [vmem:[%s10283_s12 + $0x98] sm:$0xff]   ;;  %v2324_v24 = vrot.slane %v237_v21, %v10308_v18  ;;  %v2331_v29 = vrot.slane %v2317_v25, %v10308_v18  ;;  %v7090_v30 = vld [vmem:[%s10283_s12 + $0x20] sm:$0xff]   ;;  %v7107_v36 = vld [vmem:[%s10283_s12 + $0xa8] sm:$0xff]   ;;  %p9932_p11 = pneg %p9931_p1  ;;  %p9937_p4 = scmp.lt.s32.totalorder %s9935_s30, %s9929_s21 }
  0x76   : > { %8757 = vmatpush3.bf16.msra.mxu1 %v7103_v11  ;;  %8727 = vmatprep.subr.bf16.mxu0 %v7096_v14  ;;  %v7106_v31 = vld [vmem:[%s10283_s12 + $0xa0] sm:$0xff]   ;;  %v7100_v37 = vld [vmem:[%s10283_s12 + $0x70] sm:$0xff]   ;;  %v238_v39 = vld [vmem:[%s10277_s22 + $0x8] sm:$0xff] }
  0x77   : > { %8759 = vmatprep.subr.bf16.mxu1 %v7112_v15  ;;  %v2332_v28 = vcombine.high %v2324_v24, %v2324_v24  ;;  %v2333_v32 = vcombine.high %v2331_v29, %v2331_v29  ;;  %v7116_v38 = vld [vmem:[%s10283_s12 + $0xf0] sm:$0xff]   ;;  %v7101_v42 = vld [vmem:[%s10283_s12 + $0x78] sm:$0xff]   ;;  %v2334_v44 = vcombine.high %v238_v39, %v238_v39  ;;  %v7126_v47 = vld [vmem:[%s10283_s12 + $0x140] sm:$0xff]   ;;  %v10337_v49 = vrot.slane %v238_v39, %v10308_v18  ;;  %p9938_p13 = por %p9937_p4, %p9936_p12 }
  0x78   : > { %v7092_v40 = vld [vmem:[%s10283_s12 + $0x30] sm:$0xff]   ;;  %v7117_v43 = vld [vmem:[%s10283_s12 + $0xf8] sm:$0xff]   ;;  %v7142_v48 = vld [vmem:[%s10283_s12 + $0x1c0] sm:$0xff]  }
  0x79   : > { %8729 = vmatpush3.bf16.msra.mxu0 %v7088_v16  ;;  %2717 = vmatprep.mubr.f32.mxu0 %v2332_v28  ;;  %v7108_v41 = vld [vmem:[%s10283_s12 + $0xb0] sm:$0xff]   ;;  %v7093_v45 = vld [vmem:[%s10283_s12 + $0x38] sm:$0xff]   ;;  %v10340_v50 = vrot.slane %v2334_v44, %v10308_v18  ;;  %v7118_v51 = vld [vmem:[%s10283_s12 + $0x100] sm:$0xff]   ;;  %v2349_v55 = vcombine.high %v10337_v49, %v10337_v49  ;;  %p9939_p10 = pnand %p9938_p13, %p9932_p11 }
  0x7a   : > { %8761 = vmatpush3.bf16.msra.mxu1 %v7104_v17  ;;  %8731 = vmatprep.subr.bf16.mxu0 %v7097_v19  ;;  %v7109_v46 = vld [vmem:[%s10283_s12 + $0xb8] sm:$0xff]   ;;  %v7134_v52 = vld [vmem:[%s10283_s12 + $0x180] sm:$0xff]   ;;  %v7127_v53 = vld [vmem:[%s10283_s12 + $0x148] sm:$0xff]  }
  0x7b   : > { %8763 = vmatprep.subr.bf16.mxu1 %v7113_v20  ;;  %2787 = vmatprep.mubr.f32.mxu1 %v2333_v32  ;;  %v7143_v54 = vld [vmem:[%s10283_s12 + $0x1c8] sm:$0xff]   ;;  %v2350_v56 = vcombine.high %v10340_v50, %v10340_v50  ;;  %v7128_v59 = vld [vmem:[%s10283_s12 + $0x150] sm:$0xff]   ;;  %v7129_v63 = vld [vmem:[%s10283_s12 + $0x158] sm:$0xff]  }
  0x7c   : > { %v7119_v57 = vld [vmem:[%s10283_s12 + $0x108] sm:$0xff]   ;;  %v7144_v60 = vld [vmem:[%s10283_s12 + $0x1d0] sm:$0xff]   ;;  %v7145_v0 = vld [vmem:[%s10283_s12 + $0x1d8] sm:$0xff]  }
  0x7d   : > { %8733 = vmatpush3.bf16.msra.mxu0 %v7089_v22  ;;  %v7135_v58 = vld [vmem:[%s10283_s12 + $0x188] sm:$0xff]   ;;  %v7120_v61 = vld [vmem:[%s10283_s12 + $0x110] sm:$0xff]   ;;  %v7121_v1 = vld [vmem:[%s10283_s12 + $0x118] sm:$0xff]  }
  0x7e   : > { %8765 = vmatpush3.bf16.msra.mxu1 %v7105_v23  ;;  %8735 = vmatprep.subr.bf16.mxu0 %v7098_v26  ;;  %v7136_v62 = vld [vmem:[%s10283_s12 + $0x190] sm:$0xff]   ;;  %v7137_v2 = vld [vmem:[%s10283_s12 + $0x198] sm:$0xff]   ;;  %v7130_v3 = vld [vmem:[%s10283_s12 + $0x160] sm:$0xff]  }
  0x7f   : > { %8767 = vmatprep.subr.bf16.mxu1 %v7114_v27  ;;  %v7146_v4 = vld [vmem:[%s10283_s12 + $0x1e0] sm:$0xff]   ;;  %v7131_v7 = vld [vmem:[%s10283_s12 + $0x168] sm:$0xff]   ;;  %v7132_v11 = vld [vmem:[%s10283_s12 + $0x170] sm:$0xff]  }
  0x80   : > { %v7122_v5 = vld [vmem:[%s10283_s12 + $0x120] sm:$0xff]   ;;  %v7147_v8 = vld [vmem:[%s10283_s12 + $0x1e8] sm:$0xff]   ;;  %v7148_v12 = vld [vmem:[%s10283_s12 + $0x1f0] sm:$0xff]  }
  0x81   : > { %8737 = vmatpush3.bf16.msra.mxu0 %v7090_v30  ;;  %v7138_v6 = vld [vmem:[%s10283_s12 + $0x1a0] sm:$0xff]   ;;  %v7123_v9 = vld [vmem:[%s10283_s12 + $0x128] sm:$0xff]   ;;  %v239_v13 = vld [vmem:[%s10277_s22 + $0x10] sm:$0xff] }
  0x82   : > { %8769 = vmatpush3.bf16.msra.mxu1 %v7106_v31  ;;  %8739 = vmatprep.subr.bf16.mxu0 %v7099_v33  ;;  %v7139_v10 = vld [vmem:[%s10283_s12 + $0x1a8] sm:$0xff]   ;;  %v7124_v14 = vld [vmem:[%s10283_s12 + $0x130] sm:$0xff]   ;;  %v7133_v16 = vld [vmem:[%s10283_s12 + $0x178] sm:$0xff]   ;;  %v2351_v19 = vcombine.high %v239_v13, %v239_v13 }
  0x83   : > { %8771 = vmatprep.subr.bf16.mxu1 %v7115_v34  ;;  %v7140_v15 = vld [vmem:[%s10283_s12 + $0x1b0] sm:$0xff]   ;;  %v7149_v17 = vld [vmem:[%s10283_s12 + $0x1f8] sm:$0xff]   ;;  %v7158_v22 = vld [vmem:[%s10283_s12 + $0x240] sm:$0xff]  }
  0x84   : > { %v7125_v20 = vld [vmem:[%s10283_s12 + $0x138] sm:$0xff]   ;;  %v7174_v23 = vld [vmem:[%s10283_s12 + $0x2c0] sm:$0xff]   ;;  %v10383_v25 = vrot.slane %v2351_v19, %v10308_v18  ;;  %v7159_v28 = vld [vmem:[%s10283_s12 + $0x248] sm:$0xff]  }
  0x85   : > { %8741 = vmatpush3.bf16.msra.mxu0 %v7091_v35  ;;  %v7141_v21 = vld [vmem:[%s10283_s12 + $0x1b8] sm:$0xff]   ;;  %v7150_v26 = vld [vmem:[%s10283_s12 + $0x200] sm:$0xff]   ;;  %v7151_v32 = vld [vmem:[%s10283_s12 + $0x208] sm:$0xff]  }
  0x86   : > { %8773 = vmatpush3.bf16.msra.mxu1 %v7107_v36  ;;  %8743 = vmatprep.subr.bf16.mxu0 %v7100_v37  ;;  %v7166_v27 = vld [vmem:[%s10283_s12 + $0x280] sm:$0xff]   ;;  %v2367_v31 = vcombine.high %v10383_v25, %v10383_v25  ;;  %v7167_v33 = vld [vmem:[%s10283_s12 + $0x288] sm:$0xff]   ;;  %v7160_v34 = vld [vmem:[%s10283_s12 + $0x250] sm:$0xff]  }
  0x87   : > { %8775 = vmatprep.subr.bf16.mxu1 %v7116_v38  ;;  %v7176_v35 = vld [vmem:[%s10283_s12 + $0x2d0] sm:$0xff]   ;;  %v7161_v38 = vld [vmem:[%s10283_s12 + $0x258] sm:$0xff]   ;;  %v7154_v44 = vld [vmem:[%s10283_s12 + $0x220] sm:$0xff]  }
  0x88   : > { %v7152_v36 = vld [vmem:[%s10283_s12 + $0x210] sm:$0xff]   ;;  %v7177_v39 = vld [vmem:[%s10283_s12 + $0x2d8] sm:$0xff]   ;;  %v7186_v19 = vld [vmem:[%s10283_s12 + $0x320] sm:$0xff]  }
  0x89   : > { %8745 = vmatpush3.bf16.msra.mxu0 %v7092_v40  ;;  %v7168_v37 = vld [vmem:[%s10283_s12 + $0x290] sm:$0xff]   ;;  %v7153_v40 = vld [vmem:[%s10283_s12 + $0x218] sm:$0xff]  }
  0x8a   : > { %8777 = vmatpush3.bf16.msra.mxu1 %v7108_v41  ;;  %8747 = vmatprep.subr.bf16.mxu0 %v7101_v42  ;;  %v7169_v41 = vld [vmem:[%s10283_s12 + $0x298] sm:$0xff]   ;;  %v7162_v42 = vld [vmem:[%s10283_s12 + $0x260] sm:$0xff]  }
  0x8b   : > { %8779 = vmatprep.subr.bf16.mxu1 %v7117_v43  ;;  %v7178_v43 = vld [vmem:[%s10283_s12 + $0x2e0] sm:$0xff]  }
  0x8d   : > { %8749 = vmatpush3.bf16.msra.mxu0 %v7093_v45  ;;  %v7170_v45 = vld [vmem:[%s10283_s12 + $0x2a0] sm:$0xff]  }
  0x8e   : > { %8781 = vmatpush3.bf16.msra.mxu1 %v7109_v46  ;;  %8783 = vmatprep.subr.bf16.mxu0 %v7126_v47  ;;  %v7163_v46 = vld [vmem:[%s10283_s12 + $0x268] sm:$0xff]  }
  0x8f   : > { %8815 = vmatprep.subr.bf16.mxu1 %v7142_v48  ;;  %v7179_v47 = vld [vmem:[%s10283_s12 + $0x2e8] sm:$0xff]  }
  0x90   : > { %2718 = vmatmul.mubr.f32.vlgmr.msra.gmra.mrb[0].mxu0 %v2324_v24  ;;  %v10380_v24 = vrot.slane %v239_v13, %v10308_v18  ;;  %v7155_v48 = vld [vmem:[%s10283_s12 + $0x228] sm:$0xff]   ;;  %v7209_v13 = vld [vmem:[%s10283_s12 + $0x3d8] sm:$0xff]  }
  0x91   : > { %2788 = vmatmul.mubr.f32.vlgmr.msra.gmra.mrb[0].mxu1 %v2331_v29  ;;  %8785 = vmatpush3.bf16.msra.mxu0 %v7118_v51  ;;  %v7175_v29 = vld [vmem:[%s10283_s12 + $0x2c8] sm:$0xff]   ;;  %v7180_v51 = vld [vmem:[%s10283_s12 + $0x2f0] sm:$0xff]  }
  0x92   : > { %8817 = vmatpush3.bf16.msra.mxu1 %v7134_v52  ;;  %8787 = vmatprep.subr.bf16.mxu0 %v7127_v53  ;;  %v2366_v30 = vcombine.high %v10380_v24, %v10380_v24  ;;  %v240_v52 = vld [vmem:[%s10277_s22 + $0x18] sm:$0xff]  ;;  %v7156_v53 = vld [vmem:[%s10283_s12 + $0x230] sm:$0xff]  }
  0x93   : > { %8819 = vmatprep.subr.bf16.mxu1 %v7143_v54  ;;  %2857 = vmatprep.mubr.f32.mxu0 %v2349_v55  ;;  %v7172_v54 = vld [vmem:[%s10283_s12 + $0x2b0] sm:$0xff]   ;;  %v7165_v55 = vld [vmem:[%s10283_s12 + $0x278] sm:$0xff]  }
  0x94   : > { %2927 = vmatprep.mubr.f32.mxu1 %v2350_v56  ;;  %v7181_v56 = vld [vmem:[%s10283_s12 + $0x2f8] sm:$0xff]  }
  0x95   : > { %8789 = vmatpush3.bf16.msra.mxu0 %v7119_v57  ;;  %v2368_v57 = vcombine.high %v240_v52, %v240_v52 }
  0x96   : > { %8821 = vmatpush3.bf16.msra.mxu1 %v7135_v58  ;;  %8791 = vmatprep.subr.bf16.mxu0 %v7128_v59  ;;  %v7157_v58 = vld [vmem:[%s10283_s12 + $0x238] sm:$0xff]  }
  0x97   : > { %8823 = vmatprep.subr.bf16.mxu1 %v7144_v60  ;;  %v7173_v59 = vld [vmem:[%s10283_s12 + $0x2b8] sm:$0xff]   ;;  %v7190_v60 = vld [vmem:[%s10283_s12 + $0x340] sm:$0xff]  }
  0x99   : > { %8793 = vmatpush3.bf16.msra.mxu0 %v7120_v61  ;;  %v7206_v61 = vld [vmem:[%s10283_s12 + $0x3c0] sm:$0xff]  }
  0x9a   : > { %8825 = vmatpush3.bf16.msra.mxu1 %v7136_v62  ;;  %8795 = vmatprep.subr.bf16.mxu0 %v7129_v63  ;;  %v10425_v62 = vrot.slane %v240_v52, %v10308_v18  ;;  %v10428_v63 = vrot.slane %v2368_v57, %v10308_v18  ;;  %v7241_v52 = vld [vmem:[%s10283_s12 + $0x4d8] sm:$0xff]   ;;  %v7218_v57 = vld [vmem:[%s10283_s12 + $0x420] sm:$0xff]  }
  0x9b   : > { %8827 = vmatprep.subr.bf16.mxu1 %v7145_v0  ;;  %v7182_v0 = vld [vmem:[%s10283_s12 + $0x300] sm:$0xff]  }
  0x9d   : > { %8797 = vmatpush3.bf16.msra.mxu0 %v7121_v1  ;;  %v7198_v1 = vld [vmem:[%s10283_s12 + $0x380] sm:$0xff]  }
  0x9e   : > { %8829 = vmatpush3.bf16.msra.mxu1 %v7137_v2  ;;  %8799 = vmatprep.subr.bf16.mxu0 %v7130_v3  ;;  %v7191_v2 = vld [vmem:[%s10283_s12 + $0x348] sm:$0xff]  }
  0x9f   : > { %8831 = vmatprep.subr.bf16.mxu1 %v7146_v4  ;;  %v7207_v3 = vld [vmem:[%s10283_s12 + $0x3c8] sm:$0xff]   ;;  %v2383_v4 = vcombine.high %v10425_v62, %v10425_v62 }
  0xa1   : > { %8801 = vmatpush3.bf16.msra.mxu0 %v7122_v5  ;;  %v2384_v5 = vcombine.high %v10428_v63, %v10428_v63 }
  0xa2   : > { %8833 = vmatpush3.bf16.msra.mxu1 %v7138_v6  ;;  %8803 = vmatprep.subr.bf16.mxu0 %v7131_v7  ;;  %v7183_v6 = vld [vmem:[%s10283_s12 + $0x308] sm:$0xff]  }
  0xa3   : > { %8835 = vmatprep.subr.bf16.mxu1 %v7147_v8  ;;  %v7199_v7 = vld [vmem:[%s10283_s12 + $0x388] sm:$0xff]   ;;  %v7192_v8 = vld [vmem:[%s10283_s12 + $0x350] sm:$0xff]  }
  0xa5   : > { %8805 = vmatpush3.bf16.msra.mxu0 %v7123_v9  ;;  %v7208_v9 = vld [vmem:[%s10283_s12 + $0x3d0] sm:$0xff]  }
  0xa6   : > { %8837 = vmatpush3.bf16.msra.mxu1 %v7139_v10  ;;  %8807 = vmatprep.subr.bf16.mxu0 %v7132_v11  ;;  %v7184_v10 = vld [vmem:[%s10283_s12 + $0x310] sm:$0xff]  }
  0xa7   : > { %8839 = vmatprep.subr.bf16.mxu1 %v7148_v12  ;;  %v7200_v11 = vld [vmem:[%s10283_s12 + $0x390] sm:$0xff]   ;;  %v7193_v12 = vld [vmem:[%s10283_s12 + $0x358] sm:$0xff]  }
  0xa9   : > { %8809 = vmatpush3.bf16.msra.mxu0 %v7124_v14  ;;  %v7185_v14 = vld [vmem:[%s10283_s12 + $0x318] sm:$0xff]  }
  0xaa   : > { %8841 = vmatpush3.bf16.msra.mxu1 %v7140_v15  ;;  %8811 = vmatprep.subr.bf16.mxu0 %v7133_v16  ;;  %v7201_v15 = vld [vmem:[%s10283_s12 + $0x398] sm:$0xff]   ;;  %v7194_v16 = vld [vmem:[%s10283_s12 + $0x360] sm:$0xff]  }
  0xab   : > { %8843 = vmatprep.subr.bf16.mxu1 %v7149_v17  ;;  %v7210_v17 = vld [vmem:[%s10283_s12 + $0x3e0] sm:$0xff]  }
  0xad   : > { %8813 = vmatpush3.bf16.msra.mxu0 %v7125_v20  ;;  %v7202_v20 = vld [vmem:[%s10283_s12 + $0x3a0] sm:$0xff]  }
  0xae   : > { %8845 = vmatpush3.bf16.msra.mxu1 %v7141_v21  ;;  %8847 = vmatprep.subr.bf16.mxu0 %v7158_v22  ;;  %v7195_v21 = vld [vmem:[%s10283_s12 + $0x368] sm:$0xff]  }
  0xaf   : > { %8879 = vmatprep.subr.bf16.mxu1 %v7174_v23  ;;  %v7211_v22 = vld [vmem:[%s10283_s12 + $0x3e8] sm:$0xff]  }
  0xb0   : > { %2858 = vmatmul.mubr.f32.vlgmr.msra.gmra.mrb[2].mxu0 %v10337_v49  ;;  %v7171_v49 = vld [vmem:[%s10283_s12 + $0x2a8] sm:$0xff]  }
  0xb1   : > { %2928 = vmatmul.mubr.f32.vlgmr.msra.gmra.mrb[2].mxu1 %v10340_v50  ;;  %8849 = vmatpush3.bf16.msra.mxu0 %v7150_v26  ;;  %v7164_v50 = vld [vmem:[%s10283_s12 + $0x270] sm:$0xff]   ;;  %v7187_v23 = vld [vmem:[%s10283_s12 + $0x328] sm:$0xff]  }
  0xb2   : > { %8881 = vmatpush3.bf16.msra.mxu1 %v7166_v27  ;;  %8851 = vmatprep.subr.bf16.mxu0 %v7159_v28  ;;  %v7212_v26 = vld [vmem:[%s10283_s12 + $0x3f0] sm:$0xff]   ;;  %v241_v27 = vld [vmem:[%s10277_s22 + $0x20] sm:$0xff] }
  0xb3   : > { %8883 = vmatprep.subr.bf16.mxu1 %v7175_v29  ;;  %2997 = vmatprep.mubr.f32.mxu0 %v2366_v30  ;;  %v7188_v28 = vld [vmem:[%s10283_s12 + $0x330] sm:$0xff]   ;;  %v7197_v30 = vld [vmem:[%s10283_s12 + $0x378] sm:$0xff]  }
  0xb4   : > { %3067 = vmatprep.mubr.f32.mxu1 %v2367_v31  ;;  %v7204_v29 = vld [vmem:[%s10283_s12 + $0x3b0] sm:$0xff]   ;;  %v7213_v31 = vld [vmem:[%s10283_s12 + $0x3f8] sm:$0xff]  }
  0xb5   : > { %8853 = vmatpush3.bf16.msra.mxu0 %v7151_v32  ;;  %v2385_v32 = vcombine.high %v241_v27, %v241_v27 }
  0xb6   : > { %8885 = vmatpush3.bf16.msra.mxu1 %v7167_v33  ;;  %8855 = vmatprep.subr.bf16.mxu0 %v7160_v34  ;;  %v7189_v33 = vld [vmem:[%s10283_s12 + $0x338] sm:$0xff]  }
  0xb7   : > { %8887 = vmatprep.subr.bf16.mxu1 %v7176_v35  ;;  %v7205_v34 = vld [vmem:[%s10283_s12 + $0x3b8] sm:$0xff]   ;;  %v7222_v35 = vld [vmem:[%s10283_s12 + $0x440] sm:$0xff]  }
  0xb9   : > { %8857 = vmatpush3.bf16.msra.mxu0 %v7152_v36  ;;  %v7238_v36 = vld [vmem:[%s10283_s12 + $0x4c0] sm:$0xff]  }
  0xba   : > { %8889 = vmatpush3.bf16.msra.mxu1 %v7168_v37  ;;  %8859 = vmatprep.subr.bf16.mxu0 %v7161_v38  ;;  %v10470_v37 = vrot.slane %v241_v27, %v10308_v18  ;;  %v10473_v38 = vrot.slane %v2385_v32, %v10308_v18  ;;  %v7273_v27 = vld [vmem:[%s10283_s12 + $0x5d8] sm:$0xff]   ;;  %v7250_v32 = vld [vmem:[%s10283_s12 + $0x520] sm:$0xff]  }
  0xbb   : > { %8891 = vmatprep.subr.bf16.mxu1 %v7177_v39  ;;  %v7214_v39 = vld [vmem:[%s10283_s12 + $0x400] sm:$0xff]  }
  0xbd   : > { %8861 = vmatpush3.bf16.msra.mxu0 %v7153_v40  ;;  %v7230_v40 = vld [vmem:[%s10283_s12 + $0x480] sm:$0xff]  }
  0xbe   : > { %8893 = vmatpush3.bf16.msra.mxu1 %v7169_v41  ;;  %8863 = vmatprep.subr.bf16.mxu0 %v7162_v42  ;;  %v7223_v41 = vld [vmem:[%s10283_s12 + $0x448] sm:$0xff]  }
  0xbf   : > { %8895 = vmatprep.subr.bf16.mxu1 %v7178_v43  ;;  %v7239_v42 = vld [vmem:[%s10283_s12 + $0x4c8] sm:$0xff]   ;;  %v2400_v43 = vcombine.high %v10470_v37, %v10470_v37 }
  0xc1   : > { %8865 = vmatpush3.bf16.msra.mxu0 %v7154_v44  ;;  %v2401_v44 = vcombine.high %v10473_v38, %v10473_v38 }
  0xc2   : > { %8897 = vmatpush3.bf16.msra.mxu1 %v7170_v45  ;;  %8867 = vmatprep.subr.bf16.mxu0 %v7163_v46  ;;  %v7215_v45 = vld [vmem:[%s10283_s12 + $0x408] sm:$0xff]  }
  0xc3   : > { %8899 = vmatprep.subr.bf16.mxu1 %v7179_v47  ;;  %v7231_v46 = vld [vmem:[%s10283_s12 + $0x488] sm:$0xff]   ;;  %v7224_v47 = vld [vmem:[%s10283_s12 + $0x450] sm:$0xff]  }
  0xc5   : > { %8869 = vmatpush3.bf16.msra.mxu0 %v7155_v48  ;;  %v7240_v48 = vld [vmem:[%s10283_s12 + $0x4d0] sm:$0xff]  }
  0xc6   : > { %8901 = vmatpush3.bf16.msra.mxu1 %v7171_v49  ;;  %8871 = vmatprep.subr.bf16.mxu0 %v7164_v50  ;;  %v7216_v49 = vld [vmem:[%s10283_s12 + $0x410] sm:$0xff]  }
  0xc7   : > { %8903 = vmatprep.subr.bf16.mxu1 %v7180_v51  ;;  %v7232_v50 = vld [vmem:[%s10283_s12 + $0x490] sm:$0xff]   ;;  %v7225_v51 = vld [vmem:[%s10283_s12 + $0x458] sm:$0xff]  }
  0xc9   : > { %8873 = vmatpush3.bf16.msra.mxu0 %v7156_v53  ;;  %v7217_v53 = vld [vmem:[%s10283_s12 + $0x418] sm:$0xff]  }
  0xca   : > { %8905 = vmatpush3.bf16.msra.mxu1 %v7172_v54  ;;  %8875 = vmatprep.subr.bf16.mxu0 %v7165_v55  ;;  %v7233_v54 = vld [vmem:[%s10283_s12 + $0x498] sm:$0xff]   ;;  %v7226_v55 = vld [vmem:[%s10283_s12 + $0x460] sm:$0xff]  }
  0xcb   : > { %8907 = vmatprep.subr.bf16.mxu1 %v7181_v56  ;;  %v7242_v56 = vld [vmem:[%s10283_s12 + $0x4e0] sm:$0xff]  }
  0xcd   : > { %8877 = vmatpush3.bf16.msra.mxu0 %v7157_v58  ;;  %v7234_v58 = vld [vmem:[%s10283_s12 + $0x4a0] sm:$0xff]  }
  0xce   : > { %8909 = vmatpush3.bf16.msra.mxu1 %v7173_v59  ;;  %8911 = vmatprep.subr.bf16.mxu0 %v7190_v60  ;;  %v7227_v59 = vld [vmem:[%s10283_s12 + $0x468] sm:$0xff]  }
  0xcf   : > { %8943 = vmatprep.subr.bf16.mxu1 %v7206_v61  ;;  %v7243_v60 = vld [vmem:[%s10283_s12 + $0x4e8] sm:$0xff]  }
  0xd0   : > { %2998 = vmatmul.mubr.f32.vlgmr.msra.gmra.mrb[4].mxu0 %v10380_v24  ;;  %v7203_v24 = vld [vmem:[%s10283_s12 + $0x3a8] sm:$0xff]  }
  0xd1   : > { %3068 = vmatmul.mubr.f32.vlgmr.msra.gmra.mrb[4].mxu1 %v10383_v25  ;;  %8913 = vmatpush3.bf16.msra.mxu0 %v7182_v0  ;;  %v7196_v25 = vld [vmem:[%s10283_s12 + $0x370] sm:$0xff]   ;;  %v7219_v61 = vld [vmem:[%s10283_s12 + $0x428] sm:$0xff]  }
  0xd2   : > { %8945 = vmatpush3.bf16.msra.mxu1 %v7198_v1  ;;  %8915 = vmatprep.subr.bf16.mxu0 %v7191_v2  ;;  %v7244_v0 = vld [vmem:[%s10283_s12 + $0x4f0] sm:$0xff]   ;;  %v242_v1 = vld [vmem:[%s10277_s22 + $0x28] sm:$0xff] }
  0xd3   : > { %8947 = vmatprep.subr.bf16.mxu1 %v7207_v3  ;;  %3137 = vmatprep.mubr.f32.mxu0 %v2383_v4  ;;  %v7220_v2 = vld [vmem:[%s10283_s12 + $0x430] sm:$0xff]   ;;  %v7229_v4 = vld [vmem:[%s10283_s12 + $0x478] sm:$0xff]  }
  0xd4   : > { %3207 = vmatprep.mubr.f32.mxu1 %v2384_v5  ;;  %v7236_v3 = vld [vmem:[%s10283_s12 + $0x4b0] sm:$0xff]   ;;  %v7245_v5 = vld [vmem:[%s10283_s12 + $0x4f8] sm:$0xff]  }
  0xd5   : > { %8917 = vmatpush3.bf16.msra.mxu0 %v7183_v6  ;;  %v2402_v6 = vcombine.high %v242_v1, %v242_v1 }
  0xd6   : > { %8949 = vmatpush3.bf16.msra.mxu1 %v7199_v7  ;;  %8919 = vmatprep.subr.bf16.mxu0 %v7192_v8  ;;  %v7221_v7 = vld [vmem:[%s10283_s12 + $0x438] sm:$0xff]  }
  0xd7   : > { %8951 = vmatprep.subr.bf16.mxu1 %v7208_v9  ;;  %v7237_v8 = vld [vmem:[%s10283_s12 + $0x4b8] sm:$0xff]   ;;  %v7254_v9 = vld [vmem:[%s10283_s12 + $0x540] sm:$0xff]  }
  0xd9   : > { %8921 = vmatpush3.bf16.msra.mxu0 %v7184_v10  ;;  %v7270_v10 = vld [vmem:[%s10283_s12 + $0x5c0] sm:$0xff]  }
  0xda   : > { %8953 = vmatpush3.bf16.msra.mxu1 %v7200_v11  ;;  %8923 = vmatprep.subr.bf16.mxu0 %v7193_v12  ;;  %v10515_v11 = vrot.slane %v242_v1, %v10308_v18  ;;  %v10518_v12 = vrot.slane %v2402_v6, %v10308_v18  ;;  %v7305_v1 = vld [vmem:[%s10283_s12 + $0x6d8] sm:$0xff]   ;;  %v7282_v6 = vld [vmem:[%s10283_s12 + $0x620] sm:$0xff]  }
  0xdb   : > { %8955 = vmatprep.subr.bf16.mxu1 %v7209_v13  ;;  %v7246_v13 = vld [vmem:[%s10283_s12 + $0x500] sm:$0xff]  }
  0xdd   : > { %8925 = vmatpush3.bf16.msra.mxu0 %v7185_v14  ;;  %v7262_v14 = vld [vmem:[%s10283_s12 + $0x580] sm:$0xff]  }
  0xde   : > { %8957 = vmatpush3.bf16.msra.mxu1 %v7201_v15  ;;  %8927 = vmatprep.subr.bf16.mxu0 %v7194_v16  ;;  %v7255_v15 = vld [vmem:[%s10283_s12 + $0x548] sm:$0xff]  }
  0xdf   : > { %8959 = vmatprep.subr.bf16.mxu1 %v7210_v17  ;;  %v7271_v16 = vld [vmem:[%s10283_s12 + $0x5c8] sm:$0xff]   ;;  %v2417_v17 = vcombine.high %v10515_v11, %v10515_v11 }
  0xe1   : > { %8929 = vmatpush3.bf16.msra.mxu0 %v7186_v19  ;;  %v2418_v19 = vcombine.high %v10518_v12, %v10518_v12 }
  0xe2   : > { %8961 = vmatpush3.bf16.msra.mxu1 %v7202_v20  ;;  %8931 = vmatprep.subr.bf16.mxu0 %v7195_v21  ;;  %v7247_v20 = vld [vmem:[%s10283_s12 + $0x508] sm:$0xff]  }
  0xe3   : > { %8963 = vmatprep.subr.bf16.mxu1 %v7211_v22  ;;  %v7263_v21 = vld [vmem:[%s10283_s12 + $0x588] sm:$0xff]   ;;  %v7256_v22 = vld [vmem:[%s10283_s12 + $0x550] sm:$0xff]  }
  0xe5   : > { %8933 = vmatpush3.bf16.msra.mxu0 %v7187_v23  ;;  %v7272_v23 = vld [vmem:[%s10283_s12 + $0x5d0] sm:$0xff]  }
  0xe6   : > { %8965 = vmatpush3.bf16.msra.mxu1 %v7203_v24  ;;  %8935 = vmatprep.subr.bf16.mxu0 %v7196_v25  ;;  %v7248_v24 = vld [vmem:[%s10283_s12 + $0x510] sm:$0xff]  }
  0xe7   : > { %8967 = vmatprep.subr.bf16.mxu1 %v7212_v26  ;;  %v7264_v25 = vld [vmem:[%s10283_s12 + $0x590] sm:$0xff]   ;;  %v7257_v26 = vld [vmem:[%s10283_s12 + $0x558] sm:$0xff]  }
  0xe9   : > { %8937 = vmatpush3.bf16.msra.mxu0 %v7188_v28  ;;  %v7249_v28 = vld [vmem:[%s10283_s12 + $0x518] sm:$0xff]  }
  0xea   : > { %8969 = vmatpush3.bf16.msra.mxu1 %v7204_v29  ;;  %8939 = vmatprep.subr.bf16.mxu0 %v7197_v30  ;;  %v7265_v29 = vld [vmem:[%s10283_s12 + $0x598] sm:$0xff]   ;;  %v7258_v30 = vld [vmem:[%s10283_s12 + $0x560] sm:$0xff]  }
  0xeb   : > { %8971 = vmatprep.subr.bf16.mxu1 %v7213_v31  ;;  %v7274_v31 = vld [vmem:[%s10283_s12 + $0x5e0] sm:$0xff]  }
  0xed   : > { %8941 = vmatpush3.bf16.msra.mxu0 %v7189_v33  ;;  %v7266_v33 = vld [vmem:[%s10283_s12 + $0x5a0] sm:$0xff]  }
  0xee   : > { %8973 = vmatpush3.bf16.msra.mxu1 %v7205_v34  ;;  %8975 = vmatprep.subr.bf16.mxu0 %v7222_v35  ;;  %v7259_v34 = vld [vmem:[%s10283_s12 + $0x568] sm:$0xff]  }
  0xef   : > { %9007 = vmatprep.subr.bf16.mxu1 %v7238_v36  ;;  %v7275_v35 = vld [vmem:[%s10283_s12 + $0x5e8] sm:$0xff]  }
  0xf0   : > { %3138 = vmatmul.mubr.f32.vlgmr.msra.gmra.mrb[6].mxu0 %v10425_v62  ;;  %v7235_v62 = vld [vmem:[%s10283_s12 + $0x4a8] sm:$0xff]  }
  0xf1   : > { %3208 = vmatmul.mubr.f32.vlgmr.msra.gmra.mrb[6].mxu1 %v10428_v63  ;;  %8977 = vmatpush3.bf16.msra.mxu0 %v7214_v39  ;;  %v7228_v63 = vld [vmem:[%s10283_s12 + $0x470] sm:$0xff]   ;;  %v7251_v36 = vld [vmem:[%s10283_s12 + $0x528] sm:$0xff]  }
  0xf2   : > { %9009 = vmatpush3.bf16.msra.mxu1 %v7230_v40  ;;  %8979 = vmatprep.subr.bf16.mxu0 %v7223_v41  ;;  %v7276_v39 = vld [vmem:[%s10283_s12 + $0x5f0] sm:$0xff]  }
  0xf3   : > { %9011 = vmatprep.subr.bf16.mxu1 %v7239_v42  ;;  %3277 = vmatprep.mubr.f32.mxu0 %v2400_v43  ;;  %v243_v40 = vld [vmem:[%s10277_s22 + $0x30] sm:$0xff]  ;;  %v7261_v43 = vld [vmem:[%s10283_s12 + $0x578] sm:$0xff]  }
  0xf4   : > { %3347 = vmatprep.mubr.f32.mxu1 %v2401_v44  ;;  %v7252_v41 = vld [vmem:[%s10283_s12 + $0x530] sm:$0xff]   ;;  %v7277_v44 = vld [vmem:[%s10283_s12 + $0x5f8] sm:$0xff]  }
  0xf5   : > { %8981 = vmatpush3.bf16.msra.mxu0 %v7215_v45  ;;  %v7268_v42 = vld [vmem:[%s10283_s12 + $0x5b0] sm:$0xff]   ;;  %v2419_v45 = vcombine.high %v243_v40, %v243_v40 }
  0xf6   : > { %9013 = vmatpush3.bf16.msra.mxu1 %v7231_v46  ;;  %8983 = vmatprep.subr.bf16.mxu0 %v7224_v47  ;;  %v7253_v46 = vld [vmem:[%s10283_s12 + $0x538] sm:$0xff]  }
  0xf7   : > { %9015 = vmatprep.subr.bf16.mxu1 %v7240_v48  ;;  %v7269_v47 = vld [vmem:[%s10283_s12 + $0x5b8] sm:$0xff]   ;;  %v7286_v48 = vld [vmem:[%s10283_s12 + $0x640] sm:$0xff]  }
  0xf9   : > { %8985 = vmatpush3.bf16.msra.mxu0 %v7216_v49  ;;  %v7302_v49 = vld [vmem:[%s10283_s12 + $0x6c0] sm:$0xff]  }
  0xfa   : > { %9017 = vmatpush3.bf16.msra.mxu1 %v7232_v50  ;;  %8987 = vmatprep.subr.bf16.mxu0 %v7225_v51  ;;  %v10560_v50 = vrot.slane %v243_v40, %v10308_v18  ;;  %v10563_v51 = vrot.slane %v2419_v45, %v10308_v18  ;;  %v7337_v40 = vld [vmem:[%s10283_s12 + $0x7d8] sm:$0xff]   ;;  %v7314_v45 = vld [vmem:[%s10283_s12 + $0x720] sm:$0xff]  }
  0xfb   : > { %9019 = vmatprep.subr.bf16.mxu1 %v7241_v52  ;;  %v7278_v52 = vld [vmem:[%s10283_s12 + $0x600] sm:$0xff]  }
  0xfd   : > { %8989 = vmatpush3.bf16.msra.mxu0 %v7217_v53  ;;  %v7294_v53 = vld [vmem:[%s10283_s12 + $0x680] sm:$0xff]  }
  0xfe   : > { %9021 = vmatpush3.bf16.msra.mxu1 %v7233_v54  ;;  %8991 = vmatprep.subr.bf16.mxu0 %v7226_v55  ;;  %v7287_v54 = vld [vmem:[%s10283_s12 + $0x648] sm:$0xff]  }
  0xff   : > { %9023 = vmatprep.subr.bf16.mxu1 %v7242_v56  ;;  %v7303_v55 = vld [vmem:[%s10283_s12 + $0x6c8] sm:$0xff]   ;;  %v2434_v56 = vcombine.high %v10560_v50, %v10560_v50 }
 0x101   : > { %8993 = vmatpush3.bf16.msra.mxu0 %v7218_v57  ;;  %v2435_v57 = vcombine.high %v10563_v51, %v10563_v51 }
 0x102   : > { %9025 = vmatpush3.bf16.msra.mxu1 %v7234_v58  ;;  %8995 = vmatprep.subr.bf16.mxu0 %v7227_v59  ;;  %v7279_v58 = vld [vmem:[%s10283_s12 + $0x608] sm:$0xff]  }
 0x103   : > { %9027 = vmatprep.subr.bf16.mxu1 %v7243_v60  ;;  %v7295_v59 = vld [vmem:[%s10283_s12 + $0x688] sm:$0xff]   ;;  %v7288_v60 = vld [vmem:[%s10283_s12 + $0x650] sm:$0xff]  }
 0x105   : > { %8997 = vmatpush3.bf16.msra.mxu0 %v7219_v61  ;;  %v7304_v61 = vld [vmem:[%s10283_s12 + $0x6d0] sm:$0xff]  }
 0x106   : > { %9029 = vmatpush3.bf16.msra.mxu1 %v7235_v62  ;;  %8999 = vmatprep.subr.bf16.mxu0 %v7228_v63  ;;  %v7280_v62 = vld [vmem:[%s10283_s12 + $0x610] sm:$0xff]  }
 0x107   : > { %9031 = vmatprep.subr.bf16.mxu1 %v7244_v0  ;;  %v7296_v63 = vld [vmem:[%s10283_s12 + $0x690] sm:$0xff]   ;;  %v7289_v0 = vld [vmem:[%s10283_s12 + $0x658] sm:$0xff]  }
 0x109   : > { %9001 = vmatpush3.bf16.msra.mxu0 %v7220_v2  ;;  %v7281_v2 = vld [vmem:[%s10283_s12 + $0x618] sm:$0xff]  }
 0x10a   : > { %9033 = vmatpush3.bf16.msra.mxu1 %v7236_v3  ;;  %9003 = vmatprep.subr.bf16.mxu0 %v7229_v4  ;;  %v7297_v3 = vld [vmem:[%s10283_s12 + $0x698] sm:$0xff]   ;;  %v7290_v4 = vld [vmem:[%s10283_s12 + $0x660] sm:$0xff]  }
 0x10b   : > { %9035 = vmatprep.subr.bf16.mxu1 %v7245_v5  ;;  %v7306_v5 = vld [vmem:[%s10283_s12 + $0x6e0] sm:$0xff]  }
 0x10d   : > { %9005 = vmatpush3.bf16.msra.mxu0 %v7221_v7  ;;  %v7298_v7 = vld [vmem:[%s10283_s12 + $0x6a0] sm:$0xff]  }
 0x10e   : > { %9037 = vmatpush3.bf16.msra.mxu1 %v7237_v8  ;;  %9039 = vmatprep.subr.bf16.mxu0 %v7254_v9  ;;  %v7291_v8 = vld [vmem:[%s10283_s12 + $0x668] sm:$0xff]  }
 0x10f   : > { %9071 = vmatprep.subr.bf16.mxu1 %v7270_v10  ;;  %v7307_v9 = vld [vmem:[%s10283_s12 + $0x6e8] sm:$0xff]  }
 0x110   : > { %3278 = vmatmul.mubr.f32.vlgmr.msra.gmra.mrb[8].mxu0 %v10470_v37  ;;  %v7267_v37 = vld [vmem:[%s10283_s12 + $0x5a8] sm:$0xff]  }
 0x111   : > { %3348 = vmatmul.mubr.f32.vlgmr.msra.gmra.mrb[8].mxu1 %v10473_v38  ;;  %9041 = vmatpush3.bf16.msra.mxu0 %v7246_v13  ;;  %v7260_v38 = vld [vmem:[%s10283_s12 + $0x570] sm:$0xff]   ;;  %v7283_v10 = vld [vmem:[%s10283_s12 + $0x628] sm:$0xff]  }
 0x112   : > { %9073 = vmatpush3.bf16.msra.mxu1 %v7262_v14  ;;  %9043 = vmatprep.subr.bf16.mxu0 %v7255_v15  ;;  %v7308_v13 = vld [vmem:[%s10283_s12 + $0x6f0] sm:$0xff]   ;;  %v244_v14 = vld [vmem:[%s10277_s22 + $0x38] sm:$0xff] }
 0x113   : > { %9075 = vmatprep.subr.bf16.mxu1 %v7271_v16  ;;  %3417 = vmatprep.mubr.f32.mxu0 %v2417_v17  ;;  %v7284_v15 = vld [vmem:[%s10283_s12 + $0x630] sm:$0xff]   ;;  %v7293_v17 = vld [vmem:[%s10283_s12 + $0x678] sm:$0xff]  }
 0x114   : > { %3487 = vmatprep.mubr.f32.mxu1 %v2418_v19  ;;  %v7300_v16 = vld [vmem:[%s10283_s12 + $0x6b0] sm:$0xff]   ;;  %v7309_v19 = vld [vmem:[%s10283_s12 + $0x6f8] sm:$0xff]  }
 0x115   : > { %9045 = vmatpush3.bf16.msra.mxu0 %v7247_v20  ;;  %v2436_v20 = vcombine.high %v244_v14, %v244_v14 }
 0x116   : > { %9077 = vmatpush3.bf16.msra.mxu1 %v7263_v21  ;;  %9047 = vmatprep.subr.bf16.mxu0 %v7256_v22  ;;  %v7285_v21 = vld [vmem:[%s10283_s12 + $0x638] sm:$0xff]  }
 0x117   : > { %9079 = vmatprep.subr.bf16.mxu1 %v7272_v23  ;;  %v7301_v22 = vld [vmem:[%s10283_s12 + $0x6b8] sm:$0xff]   ;;  %v7318_v23 = vld [vmem:[%s10283_s12 + $0x740] sm:$0xff]  }
 0x119   : > { %9049 = vmatpush3.bf16.msra.mxu0 %v7248_v24  ;;  %v7334_v24 = vld [vmem:[%s10283_s12 + $0x7c0] sm:$0xff]  }
 0x11a   : > { %9081 = vmatpush3.bf16.msra.mxu1 %v7264_v25  ;;  %9051 = vmatprep.subr.bf16.mxu0 %v7257_v26  ;;  %v10605_v25 = vrot.slane %v244_v14, %v10308_v18  ;;  %v10608_v26 = vrot.slane %v2436_v20, %v10308_v18  ;;  %v7343_v14 = vld [vmem:[%s10283_s12 + $0x808] sm:$0xff]   ;;  %v7360_v20 = vld [vmem:[%s10283_s12 + $0x890] sm:$0xff]  }
 0x11b   : > { %9083 = vmatprep.subr.bf16.mxu1 %v7273_v27  ;;  %v7310_v27 = vld [vmem:[%s10283_s12 + $0x700] sm:$0xff]  }
 0x11d   : > { %9053 = vmatpush3.bf16.msra.mxu0 %v7249_v28  ;;  %v7326_v28 = vld [vmem:[%s10283_s12 + $0x780] sm:$0xff]  }
 0x11e   : > { %9085 = vmatpush3.bf16.msra.mxu1 %v7265_v29  ;;  %9055 = vmatprep.subr.bf16.mxu0 %v7258_v30  ;;  %v7319_v29 = vld [vmem:[%s10283_s12 + $0x748] sm:$0xff]  }
 0x11f   : > { %9087 = vmatprep.subr.bf16.mxu1 %v7274_v31  ;;  %v7335_v30 = vld [vmem:[%s10283_s12 + $0x7c8] sm:$0xff]   ;;  %v2451_v31 = vcombine.high %v10605_v25, %v10605_v25 }
 0x121   : > { %9057 = vmatpush3.bf16.msra.mxu0 %v7250_v32  ;;  %v2452_v32 = vcombine.high %v10608_v26, %v10608_v26 }
 0x122   : > { %9089 = vmatpush3.bf16.msra.mxu1 %v7266_v33  ;;  %9059 = vmatprep.subr.bf16.mxu0 %v7259_v34  ;;  %v7311_v33 = vld [vmem:[%s10283_s12 + $0x708] sm:$0xff]  }
 0x123   : > { %9091 = vmatprep.subr.bf16.mxu1 %v7275_v35  ;;  %v7327_v34 = vld [vmem:[%s10283_s12 + $0x788] sm:$0xff]   ;;  %v7320_v35 = vld [vmem:[%s10283_s12 + $0x750] sm:$0xff]  }
 0x125   : > { %9061 = vmatpush3.bf16.msra.mxu0 %v7251_v36  ;;  %v7336_v36 = vld [vmem:[%s10283_s12 + $0x7d0] sm:$0xff]  }
 0x126   : > { %9093 = vmatpush3.bf16.msra.mxu1 %v7267_v37  ;;  %9063 = vmatprep.subr.bf16.mxu0 %v7260_v38  ;;  %v7312_v37 = vld [vmem:[%s10283_s12 + $0x710] sm:$0xff]  }
 0x127   : > { %9095 = vmatprep.subr.bf16.mxu1 %v7276_v39  ;;  %v7328_v38 = vld [vmem:[%s10283_s12 + $0x790] sm:$0xff]   ;;  %v7321_v39 = vld [vmem:[%s10283_s12 + $0x758] sm:$0xff]  }
 0x129   : > { %9065 = vmatpush3.bf16.msra.mxu0 %v7252_v41  ;;  %v7313_v41 = vld [vmem:[%s10283_s12 + $0x718] sm:$0xff]  }
 0x12a   : > { %9097 = vmatpush3.bf16.msra.mxu1 %v7268_v42  ;;  %9067 = vmatprep.subr.bf16.mxu0 %v7261_v43  ;;  %v7329_v42 = vld [vmem:[%s10283_s12 + $0x798] sm:$0xff]   ;;  %v7322_v43 = vld [vmem:[%s10283_s12 + $0x760] sm:$0xff]  }
 0x12b   : > { %9099 = vmatprep.subr.bf16.mxu1 %v7277_v44  ;;  %v7338_v44 = vld [vmem:[%s10283_s12 + $0x7e0] sm:$0xff]  }
 0x12d   : > { %9069 = vmatpush3.bf16.msra.mxu0 %v7253_v46  ;;  %v7330_v46 = vld [vmem:[%s10283_s12 + $0x7a0] sm:$0xff]  }
 0x12e   : > { %9101 = vmatpush3.bf16.msra.mxu1 %v7269_v47  ;;  %9103 = vmatprep.subr.bf16.mxu0 %v7286_v48  ;;  %v7323_v47 = vld [vmem:[%s10283_s12 + $0x768] sm:$0xff]  }
 0x12f   : > { %9135 = vmatprep.subr.bf16.mxu1 %v7302_v49  ;;  %v7339_v48 = vld [vmem:[%s10283_s12 + $0x7e8] sm:$0xff]  }
 0x130   : > { %3418 = vmatmul.mubr.f32.vlgmr.msra.gmra.mrb[10].mxu0 %v10515_v11  ;;  %v7299_v11 = vld [vmem:[%s10283_s12 + $0x6a8] sm:$0xff]  }
 0x131   : > { %3488 = vmatmul.mubr.f32.vlgmr.msra.gmra.mrb[10].mxu1 %v10518_v12  ;;  %9105 = vmatpush3.bf16.msra.mxu0 %v7278_v52  ;;  %v7292_v12 = vld [vmem:[%s10283_s12 + $0x670] sm:$0xff]   ;;  %v7315_v49 = vld [vmem:[%s10283_s12 + $0x728] sm:$0xff]  }
 0x132   : > { %9137 = vmatpush3.bf16.msra.mxu1 %v7294_v53  ;;  %9107 = vmatprep.subr.bf16.mxu0 %v7287_v54  ;;  %v7324_v53 = vld [vmem:[%s10283_s12 + $0x770] sm:$0xff]  }
 0x133   : > { %9139 = vmatprep.subr.bf16.mxu1 %v7303_v55  ;;  %3557 = vmatprep.mubr.f32.mxu0 %v2434_v56  ;;  %v7340_v54 = vld [vmem:[%s10283_s12 + $0x7f0] sm:$0xff]  }
 0x134   : > { %3627 = vmatprep.mubr.f32.mxu1 %v2435_v57  ;;  %v245_v57 = vld [vmem:[%s10277_s22 + $0x40] sm:$0xff] }
 0x135   : > { %9109 = vmatpush3.bf16.msra.mxu0 %v7279_v58 }
 0x136   : > { %9141 = vmatpush3.bf16.msra.mxu1 %v7295_v59  ;;  %9111 = vmatprep.subr.bf16.mxu0 %v7288_v60  ;;  %v7316_v60 = vld [vmem:[%s10283_s12 + $0x730] sm:$0xff]  }
 0x137   : > { %9143 = vmatprep.subr.bf16.mxu1 %v7304_v61  ;;  %v7332_v61 = vld [vmem:[%s10283_s12 + $0x7b0] sm:$0xff]  }
 0x139   : > { %9113 = vmatpush3.bf16.msra.mxu0 %v7280_v62 }
 0x13a   : > { %9145 = vmatpush3.bf16.msra.mxu1 %v7296_v63  ;;  %9115 = vmatprep.subr.bf16.mxu0 %v7289_v0  ;;  %v7325_v63 = vld [vmem:[%s10283_s12 + $0x778] sm:$0xff]  }
 0x13b   : > { %9147 = vmatprep.subr.bf16.mxu1 %v7305_v1  ;;  %v7341_v0 = vld [vmem:[%s10283_s12 + $0x7f8] sm:$0xff]   ;;  %v2453_v1 = vcombine.high %v245_v57, %v245_v57 }
 0x13d   : > { %9117 = vmatpush3.bf16.msra.mxu0 %v7281_v2  ;;  %v7317_v2 = vld [vmem:[%s10283_s12 + $0x738] sm:$0xff]  }
 0x13e   : > { %9149 = vmatpush3.bf16.msra.mxu1 %v7297_v3  ;;  %9119 = vmatprep.subr.bf16.mxu0 %v7290_v4  ;;  %v7333_v3 = vld [vmem:[%s10283_s12 + $0x7b8] sm:$0xff]   ;;  %v7350_v4 = vld [vmem:[%s10283_s12 + $0x840] sm:$0xff]  }
 0x13f   : > { %9151 = vmatprep.subr.bf16.mxu1 %v7306_v5  ;;  %v7366_v5 = vld [vmem:[%s10283_s12 + $0x8c0] sm:$0xff]  }
 0x141   : > { %9121 = vmatpush3.bf16.msra.mxu0 %v7282_v6  ;;  %v10652_v6 = vrot.slane %v245_v57, %v10308_v18  ;;  %v7383_v57 = vld [vmem:[%s10283_s12 + $0x948] sm:$0xff]  }
 0x142   : > { %9153 = vmatpush3.bf16.msra.mxu1 %v7298_v7  ;;  %9123 = vmatprep.subr.bf16.mxu0 %v7291_v8  ;;  %v10655_v7 = vrot.slane %v2453_v1, %v10308_v18  ;;  %v7342_v8 = vld [vmem:[%s10283_s12 + $0x800] sm:$0xff]   ;;  %v7376_v1 = vld [vmem:[%s10283_s12 + $0x910] sm:$0xff]  }
 0x143   : > { %9155 = vmatprep.subr.bf16.mxu1 %v7307_v9  ;;  %v7358_v9 = vld [vmem:[%s10283_s12 + $0x880] sm:$0xff]  }
 0x145   : > { %9125 = vmatpush3.bf16.msra.mxu0 %v7283_v10  ;;  %v7351_v10 = vld [vmem:[%s10283_s12 + $0x848] sm:$0xff]  }
 0x146   : > { %9157 = vmatpush3.bf16.msra.mxu1 %v7299_v11  ;;  %9127 = vmatprep.subr.bf16.mxu0 %v7292_v12  ;;  %v7367_v11 = vld [vmem:[%s10283_s12 + $0x8c8] sm:$0xff]   ;;  %v2468_v12 = vcombine.high %v10652_v6, %v10652_v6 }
 0x147   : > { %9159 = vmatprep.subr.bf16.mxu1 %v7308_v13  ;;  %v2469_v13 = vcombine.high %v10655_v7, %v10655_v7 }
 0x149   : > { %9129 = vmatpush3.bf16.msra.mxu0 %v7284_v15  ;;  %v7359_v15 = vld [vmem:[%s10283_s12 + $0x888] sm:$0xff]  }
 0x14a   : > { %9161 = vmatpush3.bf16.msra.mxu1 %v7300_v16  ;;  %9131 = vmatprep.subr.bf16.mxu0 %v7293_v17  ;;  %v7352_v16 = vld [vmem:[%s10283_s12 + $0x850] sm:$0xff]  }
 0x14b   : > { %9163 = vmatprep.subr.bf16.mxu1 %v7309_v19  ;;  %v7368_v17 = vld [vmem:[%s10283_s12 + $0x8d0] sm:$0xff]  }
 0x14c   : > { %v7344_v19 = vld [vmem:[%s10283_s12 + $0x810] sm:$0xff]  }
 0x14d   : > { %9133 = vmatpush3.bf16.msra.mxu0 %v7285_v21  ;;  %v7353_v21 = vld [vmem:[%s10283_s12 + $0x858] sm:$0xff]  }
 0x14e   : > { %9165 = vmatpush3.bf16.msra.mxu1 %v7301_v22  ;;  %9167 = vmatprep.subr.bf16.mxu0 %v7318_v23  ;;  %v7369_v22 = vld [vmem:[%s10283_s12 + $0x8d8] sm:$0xff]  }
 0x14f   : > { %9199 = vmatprep.subr.bf16.mxu1 %v7334_v24  ;;  %v7345_v23 = vld [vmem:[%s10283_s12 + $0x818] sm:$0xff]  }
 0x150   : > { %3558 = vmatmul.mubr.f32.vlgmr.msra.gmra.mrb[12].mxu0 %v10560_v50  ;;  %v7331_v50 = vld [vmem:[%s10283_s12 + $0x7a8] sm:$0xff]   ;;  %v7361_v24 = vld [vmem:[%s10283_s12 + $0x898] sm:$0xff]  }
 0x151   : > { %3628 = vmatmul.mubr.f32.vlgmr.msra.gmra.mrb[12].mxu1 %v10563_v51  ;;  %9169 = vmatpush3.bf16.msra.mxu0 %v7310_v27  ;;  %v7346_v27 = vld [vmem:[%s10283_s12 + $0x820] sm:$0xff]  }
 0x152   : > { %9201 = vmatpush3.bf16.msra.mxu1 %v7326_v28  ;;  %9171 = vmatprep.subr.bf16.mxu0 %v7319_v29  ;;  %v7362_v28 = vld [vmem:[%s10283_s12 + $0x8a0] sm:$0xff]   ;;  %v7355_v29 = vld [vmem:[%s10283_s12 + $0x868] sm:$0xff]  }
 0x153   : > { %9203 = vmatprep.subr.bf16.mxu1 %v7335_v30  ;;  %3697 = vmatprep.mubr.f32.mxu0 %v2451_v31  ;;  %v7371_v30 = vld [vmem:[%s10283_s12 + $0x8e8] sm:$0xff]  }
 0x154   : > { %3767 = vmatprep.mubr.f32.mxu1 %v2452_v32  ;;  %v7347_v31 = vld [vmem:[%s10283_s12 + $0x828] sm:$0xff]  }
 0x155   : > { %9173 = vmatpush3.bf16.msra.mxu0 %v7311_v33  ;;  %v7363_v32 = vld [vmem:[%s10283_s12 + $0x8a8] sm:$0xff]  }
 0x156   : > { %9205 = vmatpush3.bf16.msra.mxu1 %v7327_v34  ;;  %9175 = vmatprep.subr.bf16.mxu0 %v7320_v35  ;;  %v7356_v35 = vld [vmem:[%s10283_s12 + $0x870] sm:$0xff]  }
 0x157   : > { %9207 = vmatprep.subr.bf16.mxu1 %v7336_v36  ;;  %v7372_v36 = vld [vmem:[%s10283_s12 + $0x8f0] sm:$0xff]  }
 0x159   : > { %9177 = vmatpush3.bf16.msra.mxu0 %v7312_v37 }
 0x15a   : > { %9209 = vmatpush3.bf16.msra.mxu1 %v7328_v38  ;;  %9179 = vmatprep.subr.bf16.mxu0 %v7321_v39  ;;  %v246_v39 = vld [vmem:[%s10277_s22 + $0x48] sm:$0xff] }
 0x15b   : > { %9211 = vmatprep.subr.bf16.mxu1 %v7337_v40 }
 0x15d   : > { %9181 = vmatpush3.bf16.msra.mxu0 %v7313_v41 }
 0x15e   : > { %9213 = vmatpush3.bf16.msra.mxu1 %v7329_v42  ;;  %9183 = vmatprep.subr.bf16.mxu0 %v7322_v43  ;;  %v7348_v42 = vld [vmem:[%s10283_s12 + $0x830] sm:$0xff]  }
 0x15f   : > { %9215 = vmatprep.subr.bf16.mxu1 %v7338_v44  ;;  %v7364_v43 = vld [vmem:[%s10283_s12 + $0x8b0] sm:$0xff]  }
 0x161   : > { %9185 = vmatpush3.bf16.msra.mxu0 %v7314_v45  ;;  %v7357_v45 = vld [vmem:[%s10283_s12 + $0x878] sm:$0xff]  }
 0x162   : > { %9217 = vmatpush3.bf16.msra.mxu1 %v7330_v46  ;;  %9187 = vmatprep.subr.bf16.mxu0 %v7323_v47  ;;  %v7373_v46 = vld [vmem:[%s10283_s12 + $0x8f8] sm:$0xff]   ;;  %v2470_v47 = vcombine.high %v246_v39, %v246_v39 }
 0x163   : > { %9219 = vmatprep.subr.bf16.mxu1 %v7339_v48  ;;  %v7630_v51 = vpop.f32.mrb[0].mxu0 }
 0x164   : > { %v7665_v52 = vpop.f32.mrb[0].mxu1  ;;  %v7631_v55 = vpop.f32.mrb[1].mxu0 }
 0x165   : > { %v7666_v56 = vpop.f32.mrb[1].mxu1  ;;  %v7632_v58 = vadd.f32 %v7631_v55, %v7630_v51  ;;  %9189 = vmatpush3.bf16.msra.mxu0 %v7315_v49  ;;  %v7349_v49 = vld [vmem:[%s10283_s12 + $0x838] sm:$0xff]   ;;  %v7382_v51 = vld [vmem:[%s10283_s12 + $0x940] sm:$0xff]  }
 0x166   : > { %v7667_v59 = vadd.f32 %v7666_v56, %v7665_v52  ;;  %9221 = vmatpush3.bf16.msra.mxu1 %v7331_v50  ;;  %9191 = vmatprep.subr.bf16.mxu0 %v7324_v53  ;;  %v7365_v50 = vld [vmem:[%s10283_s12 + $0x8b8] sm:$0xff]   ;;  %v7398_v52 = vld [vmem:[%s10283_s12 + $0x9c0] sm:$0xff]   ;;  %v10700_v53 = vrot.slane %v246_v39, %v10308_v18 }
 0x167   : > { %9223 = vmatprep.subr.bf16.mxu1 %v7340_v54  ;;  %v10703_v54 = vrot.slane %v2470_v47, %v10308_v18  ;;  %v7374_v55 = vld [vmem:[%s10283_s12 + $0x900] sm:$0xff]   ;;  %v7432_v47 = vld [vmem:[%s10283_s12 + $0xad0] sm:$0xff]  }
 0x168   : > { %v10643_v62 = vadd.f32 %v7667_v59, %v7632_v58  ;;  %v7390_v56 = vld [vmem:[%s10283_s12 + $0x980] sm:$0xff]   ;;  %v7399_v58 = vld [vmem:[%s10283_s12 + $0x9c8] sm:$0xff]   ;;  %v2485_v59 = vcombine.high %v10700_v53, %v10700_v53 }
 0x169   : > { %9193 = vmatpush3.bf16.msra.mxu0 %v7316_v60  ;;  %v2486_v60 = vcombine.high %v10703_v54, %v10703_v54  ;;  %v7422_v39 = vld [vmem:[%s10283_s12 + $0xa80] sm:$0xff]  }
 0x16a   : > { %9225 = vmatpush3.bf16.msra.mxu1 %v7332_v61  ;;  %9195 = vmatprep.subr.bf16.mxu0 %v7325_v63  ;;  %v7375_v61 = vld [vmem:[%s10283_s12 + $0x908] sm:$0xff]   ;;  %v7384_v63 = vld [vmem:[%s10283_s12 + $0x950] sm:$0xff]  }
 0x16b   : > { %9227 = vmatprep.subr.bf16.mxu1 %v7341_v0  ;;  %v7400_v0 = vld [vmem:[%s10283_s12 + $0x9d0] sm:$0xff]  }
 0x16d   : > { %9197 = vmatpush3.bf16.msra.mxu0 %v7317_v2  ;;  %v7392_v2 = vld [vmem:[%s10283_s12 + $0x990] sm:$0xff]  }
 0x16e   : > { %9229 = vmatpush3.bf16.msra.mxu1 %v7333_v3  ;;  %9231 = vmatprep.subr.bf16.mxu0 %v7350_v4  ;;  %v7385_v3 = vld [vmem:[%s10283_s12 + $0x958] sm:$0xff]  }
 0x16f   : > { %9263 = vmatprep.subr.bf16.mxu1 %v7366_v5  ;;  %v7401_v4 = vld [vmem:[%s10283_s12 + $0x9d8] sm:$0xff]  }
 0x170   : > { %3698 = vmatmul.mubr.f32.vlgmr.msra.gmra.mrb[14].mxu0 %v10605_v25  ;;  %v7354_v25 = vld [vmem:[%s10283_s12 + $0x860] sm:$0xff]   ;;  %v7377_v5 = vld [vmem:[%s10283_s12 + $0x918] sm:$0xff]  }
 0x171   : > { %3768 = vmatmul.mubr.f32.vlgmr.msra.gmra.mrb[14].mxu1 %v10608_v26  ;;  %9233 = vmatpush3.bf16.msra.mxu0 %v7342_v8  ;;  %v7370_v26 = vld [vmem:[%s10283_s12 + $0x8e0] sm:$0xff]  }
 0x172   : > { %9265 = vmatpush3.bf16.msra.mxu1 %v7358_v9  ;;  %9235 = vmatprep.subr.bf16.mxu0 %v7351_v10  ;;  %v7402_v8 = vld [vmem:[%s10283_s12 + $0x9e0] sm:$0xff]  }
 0x173   : > { %9267 = vmatprep.subr.bf16.mxu1 %v7367_v11  ;;  %3837 = vmatprep.mubr.f32.mxu0 %v2468_v12  ;;  %v7378_v9 = vld [vmem:[%s10283_s12 + $0x920] sm:$0xff]   ;;  %v7387_v11 = vld [vmem:[%s10283_s12 + $0x968] sm:$0xff]  }
 0x174   : > { %3907 = vmatprep.mubr.f32.mxu1 %v2469_v13  ;;  %v7394_v10 = vld [vmem:[%s10283_s12 + $0x9a0] sm:$0xff]   ;;  %v7403_v12 = vld [vmem:[%s10283_s12 + $0x9e8] sm:$0xff]  }
 0x175   : > { %9237 = vmatpush3.bf16.msra.mxu0 %v7343_v14  ;;  %v7379_v13 = vld [vmem:[%s10283_s12 + $0x928] sm:$0xff]  }
 0x176   : > { %9269 = vmatpush3.bf16.msra.mxu1 %v7359_v15  ;;  %9239 = vmatprep.subr.bf16.mxu0 %v7352_v16  ;;  %v7395_v14 = vld [vmem:[%s10283_s12 + $0x9a8] sm:$0xff]  }
 0x177   : > { %9271 = vmatprep.subr.bf16.mxu1 %v7368_v17  ;;  %v7388_v17 = vld [vmem:[%s10283_s12 + $0x970] sm:$0xff]  }
 0x179   : > { %9241 = vmatpush3.bf16.msra.mxu0 %v7344_v19  ;;  %v7404_v19 = vld [vmem:[%s10283_s12 + $0x9f0] sm:$0xff]  }
 0x17a   : > { %9273 = vmatpush3.bf16.msra.mxu1 %v7360_v20  ;;  %9243 = vmatprep.subr.bf16.mxu0 %v7353_v21 }
 0x17b   : > { %9275 = vmatprep.subr.bf16.mxu1 %v7369_v22  ;;  %v247_v22 = vld [vmem:[%s10277_s22 + $0x50] sm:$0xff] }
 0x17d   : > { %9245 = vmatpush3.bf16.msra.mxu0 %v7345_v23 }
 0x17e   : > { %9277 = vmatpush3.bf16.msra.mxu1 %v7361_v24  ;;  %9247 = vmatprep.subr.bf16.mxu0 %v7354_v25  ;;  %v7380_v25 = vld [vmem:[%s10283_s12 + $0x930] sm:$0xff]  }
 0x17f   : > { %9279 = vmatprep.subr.bf16.mxu1 %v7370_v26  ;;  %v7396_v26 = vld [vmem:[%s10283_s12 + $0x9b0] sm:$0xff]  }
 0x181   : > { %9249 = vmatpush3.bf16.msra.mxu0 %v7346_v27 }
 0x182   : > { %9281 = vmatpush3.bf16.msra.mxu1 %v7362_v28  ;;  %9251 = vmatprep.subr.bf16.mxu0 %v7355_v29  ;;  %v7389_v28 = vld [vmem:[%s10283_s12 + $0x978] sm:$0xff]  }
 0x183   : > { %9283 = vmatprep.subr.bf16.mxu1 %v7371_v30  ;;  %v7700_v33 = vpop.f32.mrb[2].mxu0  ;;  %v7405_v29 = vld [vmem:[%s10283_s12 + $0x9f8] sm:$0xff]   ;;  %v2487_v30 = vcombine.high %v247_v22, %v247_v22 }
 0x184   : > { %v7735_v34 = vpop.f32.mrb[2].mxu1  ;;  %v7701_v37 = vpop.f32.mrb[3].mxu0 }
 0x185   : > { %v7736_v38 = vpop.f32.mrb[3].mxu1  ;;  %v7702_v40 = vadd.f32 %v7701_v37, %v7700_v33  ;;  %9253 = vmatpush3.bf16.msra.mxu0 %v7347_v31  ;;  %v7397_v33 = vld [vmem:[%s10283_s12 + $0x9b8] sm:$0xff]   ;;  %v10751_v37 = vrot.slane %v2487_v30, %v10308_v18  ;;  %v7464_v30 = vld [vmem:[%s10283_s12 + $0xbd0] sm:$0xff]  }
 0x186   : > { %v7737_v41 = vadd.f32 %v7736_v38, %v7735_v34  ;;  %9285 = vmatpush3.bf16.msra.mxu1 %v7363_v32  ;;  %9255 = vmatprep.subr.bf16.mxu0 %v7356_v35  ;;  %v7381_v32 = vld [vmem:[%s10283_s12 + $0x938] sm:$0xff]   ;;  %v7414_v34 = vld [vmem:[%s10283_s12 + $0xa40] sm:$0xff]  }
 0x187   : > { %9287 = vmatprep.subr.bf16.mxu1 %v7372_v36  ;;  %v2860_v44 = vadd.f32 %v7702_v40, %v10643_v62  ;;  %v7391_v62 = vld [vmem:[%s10283_s12 + $0x988] sm:$0xff]   ;;  %v7430_v35 = vld [vmem:[%s10283_s12 + $0xac0] sm:$0xff]   ;;  %v10748_v36 = vrot.slane %v247_v22, %v10308_v18 }
 0x188   : > { %v7406_v38 = vld [vmem:[%s10283_s12 + $0xa00] sm:$0xff]   ;;  %v7415_v40 = vld [vmem:[%s10283_s12 + $0xa48] sm:$0xff]  }
 0x189   : > { %v10693_v48 = vadd.f32 %v7737_v41, %v2860_v44  ;;  %9257 = vmatpush3.bf16.msra.mxu0 %v7348_v42  ;;  %v7431_v41 = vld [vmem:[%s10283_s12 + $0xac8] sm:$0xff]   ;;  %v2502_v42 = vcombine.high %v10748_v36, %v10748_v36  ;;  %v7454_v22 = vld [vmem:[%s10283_s12 + $0xb80] sm:$0xff]  }
 0x18a   : > { %9289 = vmatpush3.bf16.msra.mxu1 %v7364_v43  ;;  %9259 = vmatprep.subr.bf16.mxu0 %v7357_v45  ;;  %v2503_v43 = vcombine.high %v10751_v37, %v10751_v37  ;;  %v7407_v44 = vld [vmem:[%s10283_s12 + $0xa08] sm:$0xff]  }
 0x18b   : > { %9291 = vmatprep.subr.bf16.mxu1 %v7373_v46  ;;  %v7423_v45 = vld [vmem:[%s10283_s12 + $0xa88] sm:$0xff]   ;;  %v7416_v46 = vld [vmem:[%s10283_s12 + $0xa50] sm:$0xff]  }
 0x18d   : > { %9261 = vmatpush3.bf16.msra.mxu0 %v7349_v49  ;;  %v7424_v49 = vld [vmem:[%s10283_s12 + $0xa90] sm:$0xff]  }
 0x18e   : > { %9293 = vmatpush3.bf16.msra.mxu1 %v7365_v50  ;;  %9295 = vmatprep.subr.bf16.mxu0 %v7382_v51  ;;  %v7417_v50 = vld [vmem:[%s10283_s12 + $0xa58] sm:$0xff]  }
 0x18f   : > { %9327 = vmatprep.subr.bf16.mxu1 %v7398_v52  ;;  %v7433_v51 = vld [vmem:[%s10283_s12 + $0xad8] sm:$0xff]  }
 0x190   : > { %3838 = vmatmul.mubr.f32.vlgmr.msra.gmra.mrb[16].mxu0 %v10652_v6  ;;  %v7393_v6 = vld [vmem:[%s10283_s12 + $0x998] sm:$0xff]  }
 0x191   : > { %3908 = vmatmul.mubr.f32.vlgmr.msra.gmra.mrb[16].mxu1 %v10655_v7  ;;  %9297 = vmatpush3.bf16.msra.mxu0 %v7374_v55  ;;  %v7386_v7 = vld [vmem:[%s10283_s12 + $0x960] sm:$0xff]   ;;  %v7409_v52 = vld [vmem:[%s10283_s12 + $0xa18] sm:$0xff]  }
 0x192   : > { %9329 = vmatpush3.bf16.msra.mxu1 %v7390_v56  ;;  %9299 = vmatprep.subr.bf16.mxu0 %v7383_v57  ;;  %v7434_v55 = vld [vmem:[%s10283_s12 + $0xae0] sm:$0xff]  }
 0x193   : > { %9331 = vmatprep.subr.bf16.mxu1 %v7399_v58  ;;  %3977 = vmatprep.mubr.f32.mxu0 %v2485_v59  ;;  %v7410_v56 = vld [vmem:[%s10283_s12 + $0xa20] sm:$0xff]   ;;  %v7419_v58 = vld [vmem:[%s10283_s12 + $0xa68] sm:$0xff]  }
 0x194   : > { %4047 = vmatprep.mubr.f32.mxu1 %v2486_v60  ;;  %v7426_v57 = vld [vmem:[%s10283_s12 + $0xaa0] sm:$0xff]   ;;  %v7435_v59 = vld [vmem:[%s10283_s12 + $0xae8] sm:$0xff]  }
 0x195   : > { %9301 = vmatpush3.bf16.msra.mxu0 %v7375_v61  ;;  %v7411_v60 = vld [vmem:[%s10283_s12 + $0xa28] sm:$0xff]  }
 0x196   : > { %9333 = vmatpush3.bf16.msra.mxu1 %v7391_v62  ;;  %9303 = vmatprep.subr.bf16.mxu0 %v7384_v63  ;;  %v7427_v61 = vld [vmem:[%s10283_s12 + $0xaa8] sm:$0xff]  }
 0x197   : > { %9335 = vmatprep.subr.bf16.mxu1 %v7400_v0  ;;  %v7420_v0 = vld [vmem:[%s10283_s12 + $0xa70] sm:$0xff]  }
 0x199   : > { %9305 = vmatpush3.bf16.msra.mxu0 %v7376_v1  ;;  %v7436_v1 = vld [vmem:[%s10283_s12 + $0xaf0] sm:$0xff]  }
 0x19a   : > { %9337 = vmatpush3.bf16.msra.mxu1 %v7392_v2  ;;  %9307 = vmatprep.subr.bf16.mxu0 %v7385_v3 }
 0x19b   : > { %9339 = vmatprep.subr.bf16.mxu1 %v7401_v4  ;;  %v248_v4 = vld [vmem:[%s10277_s22 + $0x58] sm:$0xff] }
 0x19d   : > { %9309 = vmatpush3.bf16.msra.mxu0 %v7377_v5 }
 0x19e   : > { %9341 = vmatpush3.bf16.msra.mxu1 %v7393_v6  ;;  %9311 = vmatprep.subr.bf16.mxu0 %v7386_v7  ;;  %v7412_v7 = vld [vmem:[%s10283_s12 + $0xa30] sm:$0xff]  }
 0x19f   : > { %9343 = vmatprep.subr.bf16.mxu1 %v7402_v8  ;;  %v7428_v8 = vld [vmem:[%s10283_s12 + $0xab0] sm:$0xff]  }
 0x1a1   : > { %9313 = vmatpush3.bf16.msra.mxu0 %v7378_v9 }
 0x1a2   : > { %9345 = vmatpush3.bf16.msra.mxu1 %v7394_v10  ;;  %9315 = vmatprep.subr.bf16.mxu0 %v7387_v11  ;;  %v7421_v10 = vld [vmem:[%s10283_s12 + $0xa78] sm:$0xff]  }
 0x1a3   : > { %9347 = vmatprep.subr.bf16.mxu1 %v7403_v12  ;;  %v7770_v15 = vpop.f32.mrb[4].mxu0  ;;  %v7437_v11 = vld [vmem:[%s10283_s12 + $0xaf8] sm:$0xff]   ;;  %v2504_v12 = vcombine.high %v248_v4, %v248_v4 }
 0x1a4   : > { %v7805_v16 = vpop.f32.mrb[4].mxu1  ;;  %v7771_v20 = vpop.f32.mrb[5].mxu0 }
 0x1a5   : > { %v7806_v21 = vpop.f32.mrb[5].mxu1  ;;  %v7772_v23 = vadd.f32 %v7771_v20, %v7770_v15  ;;  %9317 = vmatpush3.bf16.msra.mxu0 %v7379_v13  ;;  %v7429_v15 = vld [vmem:[%s10283_s12 + $0xab8] sm:$0xff]   ;;  %v10799_v20 = vrot.slane %v2504_v12, %v10308_v18  ;;  %v7496_v12 = vld [vmem:[%s10283_s12 + $0xcd0] sm:$0xff]  }
 0x1a6   : > { %v7807_v24 = vadd.f32 %v7806_v21, %v7805_v16  ;;  %9349 = vmatpush3.bf16.msra.mxu1 %v7395_v14  ;;  %9319 = vmatprep.subr.bf16.mxu0 %v7388_v17  ;;  %v7413_v14 = vld [vmem:[%s10283_s12 + $0xa38] sm:$0xff]   ;;  %v7446_v16 = vld [vmem:[%s10283_s12 + $0xb40] sm:$0xff]  }
 0x1a7   : > { %9351 = vmatprep.subr.bf16.mxu1 %v7404_v19  ;;  %v3000_v27 = vadd.f32 %v7772_v23, %v10693_v48  ;;  %v7408_v48 = vld [vmem:[%s10283_s12 + $0xa10] sm:$0xff]   ;;  %v7462_v17 = vld [vmem:[%s10283_s12 + $0xbc0] sm:$0xff]   ;;  %v10796_v19 = vrot.slane %v248_v4, %v10308_v18  ;;  %v7447_v23 = vld [vmem:[%s10283_s12 + $0xb48] sm:$0xff]  }
 0x1a8   : > { %v7438_v21 = vld [vmem:[%s10283_s12 + $0xb00] sm:$0xff]  }
 0x1a9   : > { %v10741_v31 = vadd.f32 %v7807_v24, %v3000_v27  ;;  %9321 = vmatpush3.bf16.msra.mxu0 %v7380_v25  ;;  %v7463_v24 = vld [vmem:[%s10283_s12 + $0xbc8] sm:$0xff]   ;;  %v2519_v25 = vcombine.high %v10796_v19, %v10796_v19  ;;  %v7486_v4 = vld [vmem:[%s10283_s12 + $0xc80] sm:$0xff]  }
 0x1aa   : > { %9353 = vmatpush3.bf16.msra.mxu1 %v7396_v26  ;;  %9323 = vmatprep.subr.bf16.mxu0 %v7389_v28  ;;  %v2520_v26 = vcombine.high %v10799_v20, %v10799_v20  ;;  %v7439_v27 = vld [vmem:[%s10283_s12 + $0xb08] sm:$0xff]  }
 0x1ab   : > { %9355 = vmatprep.subr.bf16.mxu1 %v7405_v29  ;;  %v7455_v28 = vld [vmem:[%s10283_s12 + $0xb88] sm:$0xff]   ;;  %v7448_v29 = vld [vmem:[%s10283_s12 + $0xb50] sm:$0xff]  }
 0x1ad   : > { %9325 = vmatpush3.bf16.msra.mxu0 %v7381_v32  ;;  %v7456_v32 = vld [vmem:[%s10283_s12 + $0xb90] sm:$0xff]  }
 0x1ae   : > { %9357 = vmatpush3.bf16.msra.mxu1 %v7397_v33  ;;  %9359 = vmatprep.subr.bf16.mxu0 %v7414_v34  ;;  %v7449_v33 = vld [vmem:[%s10283_s12 + $0xb58] sm:$0xff]  }
 0x1af   : > { %9391 = vmatprep.subr.bf16.mxu1 %v7430_v35  ;;  %v7465_v34 = vld [vmem:[%s10283_s12 + $0xbd8] sm:$0xff]  }
 0x1b0   : > { %3978 = vmatmul.mubr.f32.vlgmr.msra.gmra.mrb[18].mxu0 %v10700_v53  ;;  %v7425_v53 = vld [vmem:[%s10283_s12 + $0xa98] sm:$0xff]  }
 0x1b1   : > { %4048 = vmatmul.mubr.f32.vlgmr.msra.gmra.mrb[18].mxu1 %v10703_v54  ;;  %9361 = vmatpush3.bf16.msra.mxu0 %v7406_v38  ;;  %v7418_v54 = vld [vmem:[%s10283_s12 + $0xa60] sm:$0xff]   ;;  %v7441_v35 = vld [vmem:[%s10283_s12 + $0xb18] sm:$0xff]  }
 0x1b2   : > { %9393 = vmatpush3.bf16.msra.mxu1 %v7422_v39  ;;  %9363 = vmatprep.subr.bf16.mxu0 %v7415_v40  ;;  %v7466_v38 = vld [vmem:[%s10283_s12 + $0xbe0] sm:$0xff]  }
 0x1b3   : > { %9395 = vmatprep.subr.bf16.mxu1 %v7431_v41  ;;  %4117 = vmatprep.mubr.f32.mxu0 %v2502_v42  ;;  %v7442_v39 = vld [vmem:[%s10283_s12 + $0xb20] sm:$0xff]   ;;  %v7451_v41 = vld [vmem:[%s10283_s12 + $0xb68] sm:$0xff]  }
 0x1b4   : > { %4187 = vmatprep.mubr.f32.mxu1 %v2503_v43  ;;  %v7458_v40 = vld [vmem:[%s10283_s12 + $0xba0] sm:$0xff]   ;;  %v7467_v42 = vld [vmem:[%s10283_s12 + $0xbe8] sm:$0xff]  }
 0x1b5   : > { %9365 = vmatpush3.bf16.msra.mxu0 %v7407_v44  ;;  %v7443_v43 = vld [vmem:[%s10283_s12 + $0xb28] sm:$0xff]  }
 0x1b6   : > { %9397 = vmatpush3.bf16.msra.mxu1 %v7423_v45  ;;  %9367 = vmatprep.subr.bf16.mxu0 %v7416_v46  ;;  %v7459_v44 = vld [vmem:[%s10283_s12 + $0xba8] sm:$0xff]  }
 0x1b7   : > { %9399 = vmatprep.subr.bf16.mxu1 %v7432_v47  ;;  %v7452_v47 = vld [vmem:[%s10283_s12 + $0xb70] sm:$0xff]  }
 0x1b9   : > { %9369 = vmatpush3.bf16.msra.mxu0 %v7408_v48  ;;  %v7468_v48 = vld [vmem:[%s10283_s12 + $0xbf0] sm:$0xff]  }
 0x1ba   : > { %9401 = vmatpush3.bf16.msra.mxu1 %v7424_v49  ;;  %9371 = vmatprep.subr.bf16.mxu0 %v7417_v50 }
 0x1bb   : > { %9403 = vmatprep.subr.bf16.mxu1 %v7433_v51  ;;  %v249_v51 = vld [vmem:[%s10277_s22 + $0x60] sm:$0xff] }
 0x1bd   : > { %9373 = vmatpush3.bf16.msra.mxu0 %v7409_v52 }
 0x1be   : > { %9405 = vmatpush3.bf16.msra.mxu1 %v7425_v53  ;;  %9375 = vmatprep.subr.bf16.mxu0 %v7418_v54  ;;  %v7444_v54 = vld [vmem:[%s10283_s12 + $0xb30] sm:$0xff]  }
 0x1bf   : > { %9407 = vmatprep.subr.bf16.mxu1 %v7434_v55  ;;  %v7460_v55 = vld [vmem:[%s10283_s12 + $0xbb0] sm:$0xff]  }
 0x1c1   : > { %9377 = vmatpush3.bf16.msra.mxu0 %v7410_v56 }
 0x1c2   : > { %9409 = vmatpush3.bf16.msra.mxu1 %v7426_v57  ;;  %9379 = vmatprep.subr.bf16.mxu0 %v7419_v58  ;;  %v7453_v57 = vld [vmem:[%s10283_s12 + $0xb78] sm:$0xff]  }
 0x1c3   : > { %9411 = vmatprep.subr.bf16.mxu1 %v7435_v59  ;;  %v7840_v62 = vpop.f32.mrb[6].mxu0  ;;  %v7469_v58 = vld [vmem:[%s10283_s12 + $0xbf8] sm:$0xff]   ;;  %v2521_v59 = vcombine.high %v249_v51, %v249_v51 }
 0x1c4   : > { %v7875_v63 = vpop.f32.mrb[6].mxu1  ;;  %v7841_v2 = vpop.f32.mrb[7].mxu0 }
 0x1c5   : > { %v7876_v3 = vpop.f32.mrb[7].mxu1  ;;  %v7842_v5 = vadd.f32 %v7841_v2, %v7840_v62  ;;  %9381 = vmatpush3.bf16.msra.mxu0 %v7411_v60  ;;  %v7461_v62 = vld [vmem:[%s10283_s12 + $0xbb8] sm:$0xff]   ;;  %v10847_v2 = vrot.slane %v2521_v59, %v10308_v18  ;;  %v7528_v59 = vld [vmem:[%s10283_s12 + $0xdd0] sm:$0xff]  }
 0x1c6   : > { %v7877_v6 = vadd.f32 %v7876_v3, %v7875_v63  ;;  %9413 = vmatpush3.bf16.msra.mxu1 %v7427_v61  ;;  %9383 = vmatprep.subr.bf16.mxu0 %v7420_v0  ;;  %v7445_v61 = vld [vmem:[%s10283_s12 + $0xb38] sm:$0xff]   ;;  %v7478_v63 = vld [vmem:[%s10283_s12 + $0xc40] sm:$0xff]  }
 0x1c7   : > { %9415 = vmatprep.subr.bf16.mxu1 %v7436_v1  ;;  %v3140_v9 = vadd.f32 %v7842_v5, %v10741_v31  ;;  %v7440_v31 = vld [vmem:[%s10283_s12 + $0xb10] sm:$0xff]   ;;  %v7494_v0 = vld [vmem:[%s10283_s12 + $0xcc0] sm:$0xff]   ;;  %v10844_v1 = vrot.slane %v249_v51, %v10308_v18  ;;  %v7479_v5 = vld [vmem:[%s10283_s12 + $0xc48] sm:$0xff]  }
 0x1c8   : > { %v7470_v3 = vld [vmem:[%s10283_s12 + $0xc00] sm:$0xff]  }
 0x1c9   : > { %v10789_v13 = vadd.f32 %v7877_v6, %v3140_v9  ;;  %9385 = vmatpush3.bf16.msra.mxu0 %v7412_v7  ;;  %v7495_v6 = vld [vmem:[%s10283_s12 + $0xcc8] sm:$0xff]   ;;  %v2536_v7 = vcombine.high %v10844_v1, %v10844_v1  ;;  %v7518_v51 = vld [vmem:[%s10283_s12 + $0xd80] sm:$0xff]  }
 0x1ca   : > { %9417 = vmatpush3.bf16.msra.mxu1 %v7428_v8  ;;  %9387 = vmatprep.subr.bf16.mxu0 %v7421_v10  ;;  %v2537_v8 = vcombine.high %v10847_v2, %v10847_v2  ;;  %v7471_v9 = vld [vmem:[%s10283_s12 + $0xc08] sm:$0xff]  }
 0x1cb   : > { %9419 = vmatprep.subr.bf16.mxu1 %v7437_v11  ;;  %v7487_v10 = vld [vmem:[%s10283_s12 + $0xc88] sm:$0xff]   ;;  %v7480_v11 = vld [vmem:[%s10283_s12 + $0xc50] sm:$0xff]  }
 0x1cd   : > { %9389 = vmatpush3.bf16.msra.mxu0 %v7413_v14  ;;  %v7488_v14 = vld [vmem:[%s10283_s12 + $0xc90] sm:$0xff]  }
 0x1ce   : > { %9421 = vmatpush3.bf16.msra.mxu1 %v7429_v15  ;;  %9423 = vmatprep.subr.bf16.mxu0 %v7446_v16  ;;  %v7481_v15 = vld [vmem:[%s10283_s12 + $0xc58] sm:$0xff]  }
 0x1cf   : > { %9455 = vmatprep.subr.bf16.mxu1 %v7462_v17  ;;  %v7497_v16 = vld [vmem:[%s10283_s12 + $0xcd8] sm:$0xff]  }
 0x1d0   : > { %4118 = vmatmul.mubr.f32.vlgmr.msra.gmra.mrb[20].mxu0 %v10748_v36  ;;  %v7457_v36 = vld [vmem:[%s10283_s12 + $0xb98] sm:$0xff]  }
 0x1d1   : > { %4188 = vmatmul.mubr.f32.vlgmr.msra.gmra.mrb[20].mxu1 %v10751_v37  ;;  %9425 = vmatpush3.bf16.msra.mxu0 %v7438_v21  ;;  %v7450_v37 = vld [vmem:[%s10283_s12 + $0xb60] sm:$0xff]   ;;  %v7473_v17 = vld [vmem:[%s10283_s12 + $0xc18] sm:$0xff]  }
 0x1d2   : > { %9457 = vmatpush3.bf16.msra.mxu1 %v7454_v22  ;;  %9427 = vmatprep.subr.bf16.mxu0 %v7447_v23  ;;  %v7498_v21 = vld [vmem:[%s10283_s12 + $0xce0] sm:$0xff]  }
 0x1d3   : > { %9459 = vmatprep.subr.bf16.mxu1 %v7463_v24  ;;  %4257 = vmatprep.mubr.f32.mxu0 %v2519_v25  ;;  %v7474_v22 = vld [vmem:[%s10283_s12 + $0xc20] sm:$0xff]   ;;  %v7483_v24 = vld [vmem:[%s10283_s12 + $0xc68] sm:$0xff]  }
 0x1d4   : > { %4327 = vmatprep.mubr.f32.mxu1 %v2520_v26  ;;  %v7490_v23 = vld [vmem:[%s10283_s12 + $0xca0] sm:$0xff]   ;;  %v7499_v25 = vld [vmem:[%s10283_s12 + $0xce8] sm:$0xff]  }
 0x1d5   : > { %9429 = vmatpush3.bf16.msra.mxu0 %v7439_v27  ;;  %v7475_v26 = vld [vmem:[%s10283_s12 + $0xc28] sm:$0xff]  }
 0x1d6   : > { %9461 = vmatpush3.bf16.msra.mxu1 %v7455_v28  ;;  %9431 = vmatprep.subr.bf16.mxu0 %v7448_v29  ;;  %v7491_v27 = vld [vmem:[%s10283_s12 + $0xca8] sm:$0xff]  }
 0x1d7   : > { %9463 = vmatprep.subr.bf16.mxu1 %v7464_v30  ;;  %v7484_v30 = vld [vmem:[%s10283_s12 + $0xc70] sm:$0xff]  }
 0x1d9   : > { %9433 = vmatpush3.bf16.msra.mxu0 %v7440_v31  ;;  %v7500_v31 = vld [vmem:[%s10283_s12 + $0xcf0] sm:$0xff]  }
 0x1da   : > { %9465 = vmatpush3.bf16.msra.mxu1 %v7456_v32  ;;  %9435 = vmatprep.subr.bf16.mxu0 %v7449_v33 }
 0x1db   : > { %9467 = vmatprep.subr.bf16.mxu1 %v7465_v34  ;;  %v250_v34 = vld [vmem:[%s10277_s22 + $0x68] sm:$0xff] }
 0x1dd   : > { %9437 = vmatpush3.bf16.msra.mxu0 %v7441_v35 }
 0x1de   : > { %9469 = vmatpush3.bf16.msra.mxu1 %v7457_v36  ;;  %9439 = vmatprep.subr.bf16.mxu0 %v7450_v37  ;;  %v7476_v37 = vld [vmem:[%s10283_s12 + $0xc30] sm:$0xff]  }
 0x1df   : > { %9471 = vmatprep.subr.bf16.mxu1 %v7466_v38  ;;  %v7492_v38 = vld [vmem:[%s10283_s12 + $0xcb0] sm:$0xff]  }
 0x1e1   : > { %9441 = vmatpush3.bf16.msra.mxu0 %v7442_v39 }
 0x1e2   : > { %9473 = vmatpush3.bf16.msra.mxu1 %v7458_v40  ;;  %9443 = vmatprep.subr.bf16.mxu0 %v7451_v41  ;;  %v7485_v40 = vld [vmem:[%s10283_s12 + $0xc78] sm:$0xff]  }
 0x1e3   : > { %9475 = vmatprep.subr.bf16.mxu1 %v7467_v42  ;;  %v7910_v45 = vpop.f32.mrb[8].mxu0  ;;  %v7501_v41 = vld [vmem:[%s10283_s12 + $0xcf8] sm:$0xff]   ;;  %v2538_v42 = vcombine.high %v250_v34, %v250_v34 }
 0x1e4   : > { %v7945_v46 = vpop.f32.mrb[8].mxu1  ;;  %v7911_v49 = vpop.f32.mrb[9].mxu0 }
 0x1e5   : > { %v7946_v50 = vpop.f32.mrb[9].mxu1  ;;  %v7912_v52 = vadd.f32 %v7911_v49, %v7910_v45  ;;  %9445 = vmatpush3.bf16.msra.mxu0 %v7443_v43  ;;  %v7493_v45 = vld [vmem:[%s10283_s12 + $0xcb8] sm:$0xff]   ;;  %v10895_v49 = vrot.slane %v2538_v42, %v10308_v18  ;;  %v7560_v42 = vld [vmem:[%s10283_s12 + $0xed0] sm:$0xff]  }
 0x1e6   : > { %v7947_v53 = vadd.f32 %v7946_v50, %v7945_v46  ;;  %9477 = vmatpush3.bf16.msra.mxu1 %v7459_v44  ;;  %9447 = vmatprep.subr.bf16.mxu0 %v7452_v47  ;;  %v7477_v44 = vld [vmem:[%s10283_s12 + $0xc38] sm:$0xff]   ;;  %v7510_v46 = vld [vmem:[%s10283_s12 + $0xd40] sm:$0xff]  }
 0x1e7   : > { %9479 = vmatprep.subr.bf16.mxu1 %v7468_v48  ;;  %v3280_v56 = vadd.f32 %v7912_v52, %v10789_v13  ;;  %v7472_v13 = vld [vmem:[%s10283_s12 + $0xc10] sm:$0xff]   ;;  %v7526_v47 = vld [vmem:[%s10283_s12 + $0xdc0] sm:$0xff]   ;;  %v10892_v48 = vrot.slane %v250_v34, %v10308_v18  ;;  %v7511_v52 = vld [vmem:[%s10283_s12 + $0xd48] sm:$0xff]  }
 0x1e8   : > { %v7502_v50 = vld [vmem:[%s10283_s12 + $0xd00] sm:$0xff]  }
 0x1e9   : > { %v10837_v60 = vadd.f32 %v7947_v53, %v3280_v56  ;;  %9449 = vmatpush3.bf16.msra.mxu0 %v7444_v54  ;;  %v7527_v53 = vld [vmem:[%s10283_s12 + $0xdc8] sm:$0xff]   ;;  %v2553_v54 = vcombine.high %v10892_v48, %v10892_v48  ;;  %v7550_v34 = vld [vmem:[%s10283_s12 + $0xe80] sm:$0xff]  }
 0x1ea   : > { %9481 = vmatpush3.bf16.msra.mxu1 %v7460_v55  ;;  %9451 = vmatprep.subr.bf16.mxu0 %v7453_v57  ;;  %v2554_v55 = vcombine.high %v10895_v49, %v10895_v49  ;;  %v7503_v56 = vld [vmem:[%s10283_s12 + $0xd08] sm:$0xff]  }
 0x1eb   : > { %9483 = vmatprep.subr.bf16.mxu1 %v7469_v58  ;;  %v7519_v57 = vld [vmem:[%s10283_s12 + $0xd88] sm:$0xff]   ;;  %v7512_v58 = vld [vmem:[%s10283_s12 + $0xd50] sm:$0xff]  }
 0x1ed   : > { %9453 = vmatpush3.bf16.msra.mxu0 %v7445_v61  ;;  %v7520_v61 = vld [vmem:[%s10283_s12 + $0xd90] sm:$0xff]  }
 0x1ee   : > { %9485 = vmatpush3.bf16.msra.mxu1 %v7461_v62  ;;  %9487 = vmatprep.subr.bf16.mxu0 %v7478_v63  ;;  %v7513_v62 = vld [vmem:[%s10283_s12 + $0xd58] sm:$0xff]  }
 0x1ef   : > { %9519 = vmatprep.subr.bf16.mxu1 %v7494_v0  ;;  %v7529_v63 = vld [vmem:[%s10283_s12 + $0xdd8] sm:$0xff]  }
 0x1f0   : > { %4258 = vmatmul.mubr.f32.vlgmr.msra.gmra.mrb[22].mxu0 %v10796_v19  ;;  %v7489_v19 = vld [vmem:[%s10283_s12 + $0xc98] sm:$0xff]  }
 0x1f1   : > { %4328 = vmatmul.mubr.f32.vlgmr.msra.gmra.mrb[22].mxu1 %v10799_v20  ;;  %9489 = vmatpush3.bf16.msra.mxu0 %v7470_v3  ;;  %v7482_v20 = vld [vmem:[%s10283_s12 + $0xc60] sm:$0xff]   ;;  %v7505_v0 = vld [vmem:[%s10283_s12 + $0xd18] sm:$0xff]  }
 0x1f2   : > { %9521 = vmatpush3.bf16.msra.mxu1 %v7486_v4  ;;  %9491 = vmatprep.subr.bf16.mxu0 %v7479_v5  ;;  %v7530_v3 = vld [vmem:[%s10283_s12 + $0xde0] sm:$0xff]  }
 0x1f3   : > { %9523 = vmatprep.subr.bf16.mxu1 %v7495_v6  ;;  %4397 = vmatprep.mubr.f32.mxu0 %v2536_v7  ;;  %v7506_v4 = vld [vmem:[%s10283_s12 + $0xd20] sm:$0xff]   ;;  %v7515_v6 = vld [vmem:[%s10283_s12 + $0xd68] sm:$0xff]  }
 0x1f4   : > { %4467 = vmatprep.mubr.f32.mxu1 %v2537_v8  ;;  %v7522_v5 = vld [vmem:[%s10283_s12 + $0xda0] sm:$0xff]   ;;  %v7531_v7 = vld [vmem:[%s10283_s12 + $0xde8] sm:$0xff]  }
 0x1f5   : > { %9493 = vmatpush3.bf16.msra.mxu0 %v7471_v9  ;;  %v7507_v8 = vld [vmem:[%s10283_s12 + $0xd28] sm:$0xff]  }
 0x1f6   : > { %9525 = vmatpush3.bf16.msra.mxu1 %v7487_v10  ;;  %9495 = vmatprep.subr.bf16.mxu0 %v7480_v11  ;;  %v7523_v9 = vld [vmem:[%s10283_s12 + $0xda8] sm:$0xff]  }
 0x1f7   : > { %9527 = vmatprep.subr.bf16.mxu1 %v7496_v12  ;;  %v7516_v12 = vld [vmem:[%s10283_s12 + $0xd70] sm:$0xff]  }
 0x1f9   : > { %9497 = vmatpush3.bf16.msra.mxu0 %v7472_v13  ;;  %v7532_v13 = vld [vmem:[%s10283_s12 + $0xdf0] sm:$0xff]  }
 0x1fa   : > { %9529 = vmatpush3.bf16.msra.mxu1 %v7488_v14  ;;  %9499 = vmatprep.subr.bf16.mxu0 %v7481_v15 }
 0x1fb   : > { %9531 = vmatprep.subr.bf16.mxu1 %v7497_v16  ;;  %v251_v16 = vld [vmem:[%s10277_s22 + $0x70] sm:$0xff] }
 0x1fd   : > { %9501 = vmatpush3.bf16.msra.mxu0 %v7473_v17 }
 0x1fe   : > { %9533 = vmatpush3.bf16.msra.mxu1 %v7489_v19  ;;  %9503 = vmatprep.subr.bf16.mxu0 %v7482_v20  ;;  %v7508_v20 = vld [vmem:[%s10283_s12 + $0xd30] sm:$0xff]  }
 0x1ff   : > { %9535 = vmatprep.subr.bf16.mxu1 %v7498_v21  ;;  %v7524_v21 = vld [vmem:[%s10283_s12 + $0xdb0] sm:$0xff]  }
 0x201   : > { %9505 = vmatpush3.bf16.msra.mxu0 %v7474_v22 }
 0x202   : > { %9537 = vmatpush3.bf16.msra.mxu1 %v7490_v23  ;;  %9507 = vmatprep.subr.bf16.mxu0 %v7483_v24  ;;  %v7517_v23 = vld [vmem:[%s10283_s12 + $0xd78] sm:$0xff]  }
 0x203   : > { %9539 = vmatprep.subr.bf16.mxu1 %v7499_v25  ;;  %v7980_v28 = vpop.f32.mrb[10].mxu0  ;;  %v7533_v24 = vld [vmem:[%s10283_s12 + $0xdf8] sm:$0xff]   ;;  %v2555_v25 = vcombine.high %v251_v16, %v251_v16 }
 0x204   : > { %v8015_v29 = vpop.f32.mrb[10].mxu1  ;;  %v7981_v32 = vpop.f32.mrb[11].mxu0 }
 0x205   : > { %v8016_v33 = vpop.f32.mrb[11].mxu1  ;;  %v7982_v35 = vadd.f32 %v7981_v32, %v7980_v28  ;;  %9509 = vmatpush3.bf16.msra.mxu0 %v7475_v26  ;;  %v7525_v28 = vld [vmem:[%s10283_s12 + $0xdb8] sm:$0xff]   ;;  %v10943_v32 = vrot.slane %v2555_v25, %v10308_v18  ;;  %v7568_v25 = vld [vmem:[%s10283_s12 + $0xf10] sm:$0xff]  }
 0x206   : > { %v8017_v36 = vadd.f32 %v8016_v33, %v8015_v29  ;;  %9541 = vmatpush3.bf16.msra.mxu1 %v7491_v27  ;;  %9511 = vmatprep.subr.bf16.mxu0 %v7484_v30  ;;  %v7509_v27 = vld [vmem:[%s10283_s12 + $0xd38] sm:$0xff]   ;;  %v7542_v29 = vld [vmem:[%s10283_s12 + $0xe40] sm:$0xff]  }
 0x207   : > { %9543 = vmatprep.subr.bf16.mxu1 %v7500_v31  ;;  %v3420_v39 = vadd.f32 %v7982_v35, %v10837_v60  ;;  %v7504_v60 = vld [vmem:[%s10283_s12 + $0xd10] sm:$0xff]   ;;  %v7558_v30 = vld [vmem:[%s10283_s12 + $0xec0] sm:$0xff]   ;;  %v10940_v31 = vrot.slane %v251_v16, %v10308_v18  ;;  %v7543_v35 = vld [vmem:[%s10283_s12 + $0xe48] sm:$0xff]  }
 0x208   : > { %v7534_v33 = vld [vmem:[%s10283_s12 + $0xe00] sm:$0xff]  }
 0x209   : > { %v10885_v43 = vadd.f32 %v8017_v36, %v3420_v39  ;;  %9513 = vmatpush3.bf16.msra.mxu0 %v7476_v37  ;;  %v7559_v36 = vld [vmem:[%s10283_s12 + $0xec8] sm:$0xff]   ;;  %v2570_v37 = vcombine.high %v10940_v31, %v10940_v31  ;;  %v7582_v16 = vld [vmem:[%s10283_s12 + $0xf80] sm:$0xff]  }
 0x20a   : > { %9545 = vmatpush3.bf16.msra.mxu1 %v7492_v38  ;;  %9515 = vmatprep.subr.bf16.mxu0 %v7485_v40  ;;  %v2571_v38 = vcombine.high %v10943_v32, %v10943_v32  ;;  %v7535_v39 = vld [vmem:[%s10283_s12 + $0xe08] sm:$0xff]  }
 0x20b   : > { %9547 = vmatprep.subr.bf16.mxu1 %v7501_v41  ;;  %v7551_v40 = vld [vmem:[%s10283_s12 + $0xe88] sm:$0xff]   ;;  %v7544_v41 = vld [vmem:[%s10283_s12 + $0xe50] sm:$0xff]  }
 0x20d   : > { %9517 = vmatpush3.bf16.msra.mxu0 %v7477_v44  ;;  %v7552_v44 = vld [vmem:[%s10283_s12 + $0xe90] sm:$0xff]  }
 0x20e   : > { %9549 = vmatpush3.bf16.msra.mxu1 %v7493_v45  ;;  %9551 = vmatprep.subr.bf16.mxu0 %v7510_v46  ;;  %v7545_v45 = vld [vmem:[%s10283_s12 + $0xe58] sm:$0xff]  }
 0x20f   : > { %9583 = vmatprep.subr.bf16.mxu1 %v7526_v47  ;;  %v7561_v46 = vld [vmem:[%s10283_s12 + $0xed8] sm:$0xff]  }
 0x210   : > { %4398 = vmatmul.mubr.f32.vlgmr.msra.gmra.mrb[24].mxu0 %v10844_v1  ;;  %v7521_v1 = vld [vmem:[%s10283_s12 + $0xd98] sm:$0xff]  }
 0x211   : > { %4468 = vmatmul.mubr.f32.vlgmr.msra.gmra.mrb[24].mxu1 %v10847_v2  ;;  %9553 = vmatpush3.bf16.msra.mxu0 %v7502_v50  ;;  %v7514_v2 = vld [vmem:[%s10283_s12 + $0xd60] sm:$0xff]   ;;  %v7537_v47 = vld [vmem:[%s10283_s12 + $0xe18] sm:$0xff]  }
 0x212   : > { %9585 = vmatpush3.bf16.msra.mxu1 %v7518_v51  ;;  %9555 = vmatprep.subr.bf16.mxu0 %v7511_v52  ;;  %v7562_v50 = vld [vmem:[%s10283_s12 + $0xee0] sm:$0xff]  }
 0x213   : > { %9587 = vmatprep.subr.bf16.mxu1 %v7527_v53  ;;  %4537 = vmatprep.mubr.f32.mxu0 %v2553_v54  ;;  %v7538_v51 = vld [vmem:[%s10283_s12 + $0xe20] sm:$0xff]   ;;  %v7547_v53 = vld [vmem:[%s10283_s12 + $0xe68] sm:$0xff]  }
 0x214   : > { %4607 = vmatprep.mubr.f32.mxu1 %v2554_v55  ;;  %v7554_v52 = vld [vmem:[%s10283_s12 + $0xea0] sm:$0xff]   ;;  %v7563_v54 = vld [vmem:[%s10283_s12 + $0xee8] sm:$0xff]  }
 0x215   : > { %9557 = vmatpush3.bf16.msra.mxu0 %v7503_v56  ;;  %v7539_v55 = vld [vmem:[%s10283_s12 + $0xe28] sm:$0xff]  }
 0x216   : > { %9589 = vmatpush3.bf16.msra.mxu1 %v7519_v57  ;;  %9559 = vmatprep.subr.bf16.mxu0 %v7512_v58  ;;  %v7555_v56 = vld [vmem:[%s10283_s12 + $0xea8] sm:$0xff]  }
 0x217   : > { %9591 = vmatprep.subr.bf16.mxu1 %v7528_v59  ;;  %v7548_v59 = vld [vmem:[%s10283_s12 + $0xe70] sm:$0xff]  }
 0x219   : > { %9561 = vmatpush3.bf16.msra.mxu0 %v7504_v60  ;;  %v7564_v60 = vld [vmem:[%s10283_s12 + $0xef0] sm:$0xff]  }
 0x21a   : > { %9593 = vmatpush3.bf16.msra.mxu1 %v7520_v61  ;;  %9563 = vmatprep.subr.bf16.mxu0 %v7513_v62 }
 0x21b   : > { %9595 = vmatprep.subr.bf16.mxu1 %v7529_v63  ;;  %v252_v63 = vld [vmem:[%s10277_s22 + $0x78] sm:$0xff] }
 0x21d   : > { %9565 = vmatpush3.bf16.msra.mxu0 %v7505_v0 }
 0x21e   : > { %9597 = vmatpush3.bf16.msra.mxu1 %v7521_v1  ;;  %9567 = vmatprep.subr.bf16.mxu0 %v7514_v2  ;;  %v7540_v2 = vld [vmem:[%s10283_s12 + $0xe30] sm:$0xff]  }
 0x21f   : > { %9599 = vmatprep.subr.bf16.mxu1 %v7530_v3  ;;  %v7556_v3 = vld [vmem:[%s10283_s12 + $0xeb0] sm:$0xff]  }
 0x221   : > { %9569 = vmatpush3.bf16.msra.mxu0 %v7506_v4 }
 0x222   : > { %9601 = vmatpush3.bf16.msra.mxu1 %v7522_v5  ;;  %9571 = vmatprep.subr.bf16.mxu0 %v7515_v6  ;;  %v7549_v5 = vld [vmem:[%s10283_s12 + $0xe78] sm:$0xff]  }
 0x223   : > { %9603 = vmatprep.subr.bf16.mxu1 %v7531_v7  ;;  %v8050_v10 = vpop.f32.mrb[12].mxu0  ;;  %v7565_v6 = vld [vmem:[%s10283_s12 + $0xef8] sm:$0xff]   ;;  %v2572_v7 = vcombine.high %v252_v63, %v252_v63 }
 0x224   : > { %v8085_v11 = vpop.f32.mrb[12].mxu1  ;;  %v8051_v14 = vpop.f32.mrb[13].mxu0 }
 0x225   : > { %v8086_v15 = vpop.f32.mrb[13].mxu1  ;;  %v8052_v17 = vadd.f32 %v8051_v14, %v8050_v10  ;;  %9573 = vmatpush3.bf16.msra.mxu0 %v7507_v8  ;;  %v7557_v10 = vld [vmem:[%s10283_s12 + $0xeb8] sm:$0xff]   ;;  %v10991_v14 = vrot.slane %v2572_v7, %v10308_v18 }
 0x226   : > { %v8087_v19 = vadd.f32 %v8086_v15, %v8085_v11  ;;  %9605 = vmatpush3.bf16.msra.mxu1 %v7523_v9  ;;  %9575 = vmatprep.subr.bf16.mxu0 %v7516_v12  ;;  %v7541_v9 = vld [vmem:[%s10283_s12 + $0xe38] sm:$0xff]   ;;  %v7574_v11 = vld [vmem:[%s10283_s12 + $0xf40] sm:$0xff]  }
 0x227   : > { %9607 = vmatprep.subr.bf16.mxu1 %v7532_v13  ;;  %v3560_v22 = vadd.f32 %v8052_v17, %v10885_v43  ;;  %v7536_v43 = vld [vmem:[%s10283_s12 + $0xe10] sm:$0xff]   ;;  %v7590_v12 = vld [vmem:[%s10283_s12 + $0xfc0] sm:$0xff]   ;;  %v10988_v13 = vrot.slane %v252_v63, %v10308_v18  ;;  %v7575_v17 = vld [vmem:[%s10283_s12 + $0xf48] sm:$0xff]  }
 0x228   : > { %v7566_v15 = vld [vmem:[%s10283_s12 + $0xf00] sm:$0xff]   ;;  %v7567_v18 = vld [vmem:[%s10283_s12 + $0xf08] sm:$0xff]  }
 0x229   : > { %v10933_v26 = vadd.f32 %v8087_v19, %v3560_v22  ;;  %9577 = vmatpush3.bf16.msra.mxu0 %v7508_v20  ;;  %v7591_v19 = vld [vmem:[%s10283_s12 + $0xfc8] sm:$0xff]   ;;  %v2587_v20 = vcombine.high %v10988_v13, %v10988_v13 }
 0x22a   : > { %9609 = vmatpush3.bf16.msra.mxu1 %v7524_v21  ;;  %9579 = vmatprep.subr.bf16.mxu0 %v7517_v23  ;;  %v2588_v21 = vcombine.high %v10991_v14, %v10991_v14  ;;  %v7583_v22 = vld [vmem:[%s10283_s12 + $0xf88] sm:$0xff]   ;;  %v7576_v23 = vld [vmem:[%s10283_s12 + $0xf50] sm:$0xff]  }
 0x22b   : > { %9611 = vmatprep.subr.bf16.mxu1 %v7533_v24  ;;  %v7592_v24 = vld [vmem:[%s10283_s12 + $0xfd0] sm:$0xff]  }
 0x22d   : > { %9581 = vmatpush3.bf16.msra.mxu0 %v7509_v27  ;;  %v7577_v27 = vld [vmem:[%s10283_s12 + $0xf58] sm:$0xff]  }
 0x22e   : > { %9613 = vmatpush3.bf16.msra.mxu1 %v7525_v28  ;;  %9615 = vmatprep.subr.bf16.mxu0 %v7542_v29  ;;  %v7593_v28 = vld [vmem:[%s10283_s12 + $0xfd8] sm:$0xff]  }
 0x22f   : > { %9647 = vmatprep.subr.bf16.mxu1 %v7558_v30  ;;  %v7569_v29 = vld [vmem:[%s10283_s12 + $0xf18] sm:$0xff]  }
 0x230   : > { %4538 = vmatmul.mubr.f32.vlgmr.msra.gmra.mrb[26].mxu0 %v10892_v48  ;;  %v7553_v48 = vld [vmem:[%s10283_s12 + $0xe98] sm:$0xff]  }
 0x231   : > { %4608 = vmatmul.mubr.f32.vlgmr.msra.gmra.mrb[26].mxu1 %v10895_v49  ;;  %9617 = vmatpush3.bf16.msra.mxu0 %v7534_v33  ;;  %v7546_v49 = vld [vmem:[%s10283_s12 + $0xe60] sm:$0xff]   ;;  %v7585_v30 = vld [vmem:[%s10283_s12 + $0xf98] sm:$0xff]  }
 0x232   : > { %9649 = vmatpush3.bf16.msra.mxu1 %v7550_v34  ;;  %9619 = vmatprep.subr.bf16.mxu0 %v7543_v35  ;;  %v7570_v33 = vld [vmem:[%s10283_s12 + $0xf20] sm:$0xff]   ;;  %v7579_v35 = vld [vmem:[%s10283_s12 + $0xf68] sm:$0xff]  }
 0x233   : > { %9651 = vmatprep.subr.bf16.mxu1 %v7559_v36  ;;  %4677 = vmatprep.mubr.f32.mxu0 %v2570_v37  ;;  %v7586_v34 = vld [vmem:[%s10283_s12 + $0xfa0] sm:$0xff]   ;;  %v7595_v36 = vld [vmem:[%s10283_s12 + $0xfe8] sm:$0xff]  }
 0x234   : > { %4747 = vmatprep.mubr.f32.mxu1 %v2571_v38  ;;  %v7571_v37 = vld [vmem:[%s10283_s12 + $0xf28] sm:$0xff]  }
 0x235   : > { %9621 = vmatpush3.bf16.msra.mxu0 %v7535_v39  ;;  %v7587_v38 = vld [vmem:[%s10283_s12 + $0xfa8] sm:$0xff]  }
 0x236   : > { %9653 = vmatpush3.bf16.msra.mxu1 %v7551_v40  ;;  %9623 = vmatprep.subr.bf16.mxu0 %v7544_v41  ;;  %v7580_v41 = vld [vmem:[%s10283_s12 + $0xf70] sm:$0xff]  }
 0x237   : > { %9655 = vmatprep.subr.bf16.mxu1 %v7560_v42  ;;  %v7596_v42 = vld [vmem:[%s10283_s12 + $0xff0] sm:$0xff]  }
 0x239   : > { %9625 = vmatpush3.bf16.msra.mxu0 %v7536_v43 }
 0x23a   : > { %9657 = vmatpush3.bf16.msra.mxu1 %v7552_v44  ;;  %9627 = vmatprep.subr.bf16.mxu0 %v7545_v45 }
 0x23b   : > { %9659 = vmatprep.subr.bf16.mxu1 %v7561_v46 }
 0x23d   : > { %9629 = vmatpush3.bf16.msra.mxu0 %v7537_v47  ;;  %v7572_v47 = vld [vmem:[%s10283_s12 + $0xf30] sm:$0xff]  }
 0x23e   : > { %9661 = vmatpush3.bf16.msra.mxu1 %v7553_v48  ;;  %9631 = vmatprep.subr.bf16.mxu0 %v7546_v49  ;;  %v7588_v48 = vld [vmem:[%s10283_s12 + $0xfb0] sm:$0xff]  }
 0x23f   : > { %9663 = vmatprep.subr.bf16.mxu1 %v7562_v50  ;;  %v7581_v50 = vld [vmem:[%s10283_s12 + $0xf78] sm:$0xff]  }
 0x241   : > { %9633 = vmatpush3.bf16.msra.mxu0 %v7538_v51  ;;  %v7597_v51 = vld [vmem:[%s10283_s12 + $0xff8] sm:$0xff]  }
 0x242   : > { %9665 = vmatpush3.bf16.msra.mxu1 %v7554_v52  ;;  %9635 = vmatprep.subr.bf16.mxu0 %v7547_v53  ;;  %v7573_v53 = vld [vmem:[%s10283_s12 + $0xf38] sm:$0xff]  }
 0x243   : > { %9667 = vmatprep.subr.bf16.mxu1 %v7563_v54  ;;  %v8120_v57 = vpop.f32.mrb[14].mxu0  ;;  %v7589_v54 = vld [vmem:[%s10283_s12 + $0xfb8] sm:$0xff]  }
 0x244   : > { %v8155_v58 = vpop.f32.mrb[14].mxu1  ;;  %v8121_v61 = vpop.f32.mrb[15].mxu0 }
 0x245   : > { %v8156_v62 = vpop.f32.mrb[15].mxu1  ;;  %v8122_v0 = vadd.f32 %v8121_v61, %v8120_v57  ;;  %9637 = vmatpush3.bf16.msra.mxu0 %v7539_v55 }
 0x246   : > { %v8157_v1 = vadd.f32 %v8156_v62, %v8155_v58  ;;  %9669 = vmatpush3.bf16.msra.mxu1 %v7555_v56  ;;  %9639 = vmatprep.subr.bf16.mxu0 %v7548_v59 }
 0x247   : > { %9671 = vmatprep.subr.bf16.mxu1 %v7564_v60  ;;  %v3700_v4 = vadd.f32 %v8122_v0, %v10933_v26  ;;  %v7584_v26 = vld [vmem:[%s10283_s12 + $0xf90] sm:$0xff]  }
 0x249   : > { %v10981_v8 = vadd.f32 %v8157_v1, %v3700_v4  ;;  %9641 = vmatpush3.bf16.msra.mxu0 %v7540_v2 }
 0x24a   : > { %9673 = vmatpush3.bf16.msra.mxu1 %v7556_v3  ;;  %9643 = vmatprep.subr.bf16.mxu0 %v7549_v5 }
 0x24b   : > { %9675 = vmatprep.subr.bf16.mxu1 %v7565_v6 }
 0x24d   : > { %9645 = vmatpush3.bf16.msra.mxu0 %v7541_v9 }
 0x24e   : > { %9677 = vmatpush3.bf16.msra.mxu1 %v7557_v10  ;;  %9679 = vmatprep.subr.bf16.mxu0 %v7574_v11 }
 0x24f   : > { %9711 = vmatprep.subr.bf16.mxu1 %v7590_v12 }
 0x250   : > { %4678 = vmatmul.mubr.f32.vlgmr.msra.gmra.mrb[28].mxu0 %v10940_v31  ;;  %v7578_v31 = vld [vmem:[%s10283_s12 + $0xf60] sm:$0xff]  }
 0x251   : > { %4748 = vmatmul.mubr.f32.vlgmr.msra.gmra.mrb[28].mxu1 %v10943_v32  ;;  %9681 = vmatpush3.bf16.msra.mxu0 %v7566_v15  ;;  %v7594_v32 = vld [vmem:[%s10283_s12 + $0xfe0] sm:$0xff]  }
 0x252   : > { %9713 = vmatpush3.bf16.msra.mxu1 %v7582_v16  ;;  %9683 = vmatprep.subr.bf16.mxu0 %v7575_v17 }
 0x253   : > { %9715 = vmatprep.subr.bf16.mxu1 %v7591_v19  ;;  %4817 = vmatprep.mubr.f32.mxu0 %v2587_v20 }
 0x254   : > { %4887 = vmatprep.mubr.f32.mxu1 %v2588_v21 }
 0x255   : > { %9685 = vmatpush3.bf16.msra.mxu0 %v7567_v18 }
 0x256   : > { %9717 = vmatpush3.bf16.msra.mxu1 %v7583_v22  ;;  %9687 = vmatprep.subr.bf16.mxu0 %v7576_v23 }
 0x257   : > { %9719 = vmatprep.subr.bf16.mxu1 %v7592_v24 }
 0x259   : > { %9689 = vmatpush3.bf16.msra.mxu0 %v7568_v25 }
 0x25a   : > { %9721 = vmatpush3.bf16.msra.mxu1 %v7584_v26  ;;  %9691 = vmatprep.subr.bf16.mxu0 %v7577_v27 }
 0x25b   : > { %9723 = vmatprep.subr.bf16.mxu1 %v7593_v28 }
 0x25d   : > { %9693 = vmatpush3.bf16.msra.mxu0 %v7569_v29 }
 0x25e   : > { %9725 = vmatpush3.bf16.msra.mxu1 %v7585_v30  ;;  %9695 = vmatprep.subr.bf16.mxu0 %v7578_v31 }
 0x25f   : > { %9727 = vmatprep.subr.bf16.mxu1 %v7594_v32 }
 0x261   : > { %9697 = vmatpush3.bf16.msra.mxu0 %v7570_v33 }
 0x262   : > { %9729 = vmatpush3.bf16.msra.mxu1 %v7586_v34  ;;  %9699 = vmatprep.subr.bf16.mxu0 %v7579_v35 }
 0x263   : > { %9731 = vmatprep.subr.bf16.mxu1 %v7595_v36  ;;  %v8190_v39 = vpop.f32.mrb[16].mxu0 }
 0x264   : > { %v8225_v40 = vpop.f32.mrb[16].mxu1  ;;  %v8191_v43 = vpop.f32.mrb[17].mxu0 }
 0x265   : > { %v8226_v44 = vpop.f32.mrb[17].mxu1  ;;  %v8192_v45 = vadd.f32 %v8191_v43, %v8190_v39  ;;  %9701 = vmatpush3.bf16.msra.mxu0 %v7571_v37 }
 0x266   : > { %v8227_v46 = vadd.f32 %v8226_v44, %v8225_v40  ;;  %9733 = vmatpush3.bf16.msra.mxu1 %v7587_v38  ;;  %9703 = vmatprep.subr.bf16.mxu0 %v7580_v41 }
 0x267   : > { %9735 = vmatprep.subr.bf16.mxu1 %v7596_v42  ;;  %v3840_v49 = vadd.f32 %v8192_v45, %v10981_v8 }
 0x269   : > { %v3910_v52 = vadd.f32 %v8227_v46, %v3840_v49  ;;  %9705 = vmatpush3.bf16.msra.mxu0 %v7572_v47  ;;  %v236_v46 = vld [vmem:[%s10292_s24] sm:$0x3] }
 0x26a   : > { %9737 = vmatpush3.bf16.msra.mxu1 %v7588_v48  ;;  %9707 = vmatprep.subr.bf16.mxu0 %v7581_v50 }
 0x26b   : > { %9739 = vmatprep.subr.bf16.mxu1 %v7597_v51 }
 0x26d   : > { %9709 = vmatpush3.bf16.msra.mxu0 %v7573_v53 }
 0x26e   : > { %9741 = vmatpush3.bf16.msra.mxu1 %v7589_v54 }
 0x270   : > { %4818 = vmatmul.mubr.f32.vlgmr.msra.gmra.mrb[30].mxu0 %v10988_v13 }
 0x271   : > { %4888 = vmatmul.mubr.f32.vlgmr.msra.gmra.mrb[30].mxu1 %v10991_v14 }
 0x283   : > { %v8260_v55 = vpop.f32.mrb[18].mxu0 }
 0x284   : > { %v8295_v56 = vpop.f32.mrb[18].mxu1  ;;  %v8261_v57 = vpop.f32.mrb[19].mxu0 }
 0x285   : > { %v8296_v58 = vpop.f32.mrb[19].mxu1  ;;  %v8262_v59 = vadd.f32 %v8261_v57, %v8260_v55 }
 0x286   : > { %v8297_v60 = vadd.f32 %v8296_v58, %v8295_v56 }
 0x287   : > { %v3980_v61 = vadd.f32 %v8262_v59, %v3910_v52 }
 0x289   : > { %v4050_v62 = vadd.f32 %v8297_v60, %v3980_v61 }
 0x2a3   : > { %v8330_v63 = vpop.f32.mrb[20].mxu0 }
 0x2a4   : > { %v8365_v0 = vpop.f32.mrb[20].mxu1  ;;  %v8331_v1 = vpop.f32.mrb[21].mxu0 }
 0x2a5   : > { %v8366_v2 = vpop.f32.mrb[21].mxu1  ;;  %v8332_v3 = vadd.f32 %v8331_v1, %v8330_v63 }
 0x2a6   : > { %v8367_v4 = vadd.f32 %v8366_v2, %v8365_v0 }
 0x2a7   : > { %v4120_v5 = vadd.f32 %v8332_v3, %v4050_v62 }
 0x2a9   : > { %v4190_v6 = vadd.f32 %v8367_v4, %v4120_v5 }
 0x2c3   : > { %v8400_v7 = vpop.f32.mrb[22].mxu0 }
 0x2c4   : > { %v8435_v8 = vpop.f32.mrb[22].mxu1  ;;  %v8401_v9 = vpop.f32.mrb[23].mxu0 }
 0x2c5   : > { %v8436_v10 = vpop.f32.mrb[23].mxu1  ;;  %v8402_v11 = vadd.f32 %v8401_v9, %v8400_v7 }
 0x2c6   : > { %v8437_v12 = vadd.f32 %v8436_v10, %v8435_v8 }
 0x2c7   : > { %v4260_v13 = vadd.f32 %v8402_v11, %v4190_v6 }
 0x2c9   : > { %v4330_v14 = vadd.f32 %v8437_v12, %v4260_v13 }
 0x2e3   : > { %v8470_v15 = vpop.f32.mrb[24].mxu0 }
 0x2e4   : > { %v8505_v16 = vpop.f32.mrb[24].mxu1  ;;  %v8471_v17 = vpop.f32.mrb[25].mxu0 }
 0x2e5   : > { %v8506_v19 = vpop.f32.mrb[25].mxu1  ;;  %v8472_v20 = vadd.f32 %v8471_v17, %v8470_v15 }
 0x2e6   : > { %v8507_v21 = vadd.f32 %v8506_v19, %v8505_v16 }
 0x2e7   : > { %v4400_v18 = vadd.f32 %v8472_v20, %v4330_v14 }
 0x2e9   : > { %v4470_v22 = vadd.f32 %v8507_v21, %v4400_v18 }
 0x303   : > { %v8540_v23 = vpop.f32.mrb[26].mxu0 }
 0x304   : > { %v8575_v24 = vpop.f32.mrb[26].mxu1  ;;  %v8541_v25 = vpop.f32.mrb[27].mxu0 }
 0x305   : > { %v8576_v26 = vpop.f32.mrb[27].mxu1  ;;  %v8542_v27 = vadd.f32 %v8541_v25, %v8540_v23 }
 0x306   : > { %v8577_v28 = vadd.f32 %v8576_v26, %v8575_v24 }
 0x307   : > { %v4540_v29 = vadd.f32 %v8542_v27, %v4470_v22 }
 0x309   : > { %v4610_v30 = vadd.f32 %v8577_v28, %v4540_v29 }
 0x323   : > { %v8610_v31 = vpop.f32.mrb[28].mxu0 }
 0x324   : > { %v8645_v32 = vpop.f32.mrb[28].mxu1  ;;  %v8611_v33 = vpop.f32.mrb[29].mxu0 }
 0x325   : > { %v8646_v34 = vpop.f32.mrb[29].mxu1  ;;  %v8612_v35 = vadd.f32 %v8611_v33, %v8610_v31 }
 0x326   : > { %v8647_v36 = vadd.f32 %v8646_v34, %v8645_v32 }
 0x327   : > { %v4680_v37 = vadd.f32 %v8612_v35, %v4610_v30 }
 0x329   : > { %v4750_v38 = vadd.f32 %v8647_v36, %v4680_v37 }
 0x343   : > { %v8680_v39 = vpop.f32.mrb[30].mxu0 }
 0x344   : > { %v8715_v40 = vpop.f32.mrb[30].mxu1  ;;  %v8681_v41 = vpop.f32.mrb[31].mxu0 }
 0x345   : > { %v8716_v42 = vpop.f32.mrb[31].mxu1  ;;  %v8682_v43 = vadd.f32 %v8681_v41, %v8680_v39 }
 0x346   : > { %v8717_v44 = vadd.f32 %v8716_v42, %v8715_v40 }
 0x347   : > { %v4820_v45 = vadd.f32 %v8682_v43, %v4750_v38 }
 0x349   : > { %v4890_v47 = vadd.f32 %v8717_v44, %v4820_v45 }
 0x34b   : > { %v4893_v48 = vadd.f32 %v4890_v47, %v236_v46 }
 0x34d   : > { %4895 = vst.msk [vmem:[%s10292_s24] sm:$0x3] %vm4894_vm1, %v4893_v48 }
 0x34e   : > { %9942 = shalt.err (!%p9939_p10)
}
 0x34f   : > { %s9943_s22 = scalar_lea.hbm %s11038_s26, 32  ;;  %s9947_s12 = scalar_lea.hbm %s11105_s2, 64 }
 0x350   : > { %p9944_p0 = scmp.ne.s32.totalorder %s11038_s26, %s9943_s22  ;;  %p9948_p5 = scmp.lt.u32.totalorder %s11038_s26, %s11105_s2 }
 0x351   : > { %p9949_p7 = scmp.lt.u32.totalorder %s9947_s12, %s9943_s22  ;;  %p9951_p8 = scmp.lt.u32.totalorder %s9943_s22, %s11038_s26 }
 0x352   : > { %p9945_p6 = pnand %p9944_p0, %p11123_p2 }
 0x353   : > { %p9950_p3 = por %p9949_p7, %p9948_p5 }
 0x354   : > { %p9946_p9 = pneg %p9945_p6 }
 0x355   : > { %p9952_p1 = por %p9951_p8, %p9950_p3 }
 0x357   : > { %p9953_p11 = pnand %p9952_p1, %p9946_p9 }
 0x359   : > { %9956 = shalt.err (!%p9953_p11)
}
 0x35a   : > { %9746 = dma.vmem_to_hbm [thread:$0]  (%p11123_p2), %s11040_s28, 32, %s11038_s26, %s4897_s4  }
 0x35b PF: > { %p9760_p12 = scmp.ge.s32.totalorder %s10055_s19, 2  ;;  %s4922_s24 = sand.u32 1, %s10015_s9  }
 0x35c   : > { %p11124_p4 = scmp.ne.s32.totalorder %s11116_s20, 0  ;;  %s4923_s15 = scalar_lea.sflag [#allocation4], %s4922_s24 }
 0x35e   : > { %p9756_p13 = pnand %p9760_p12, %p11124_p4 }
 0x360   : > { %10010 = dma.done.wait (!%p9756_p13), %s4923_s15, 32  }
 0x361   : > { %10012 = vsyncadd (!%p9756_p13), %s4923_s15, 4294967264  ;;  %s21_s19 = sadd.s32 1, %s10055_s19   ;;  %s11125_s6 = sld [smem:[#allocation11_spill]] }
 0x362   : > { %p18_p10 = scmp.ge.s32.totalorder %s21_s19, 8   ;;  %s11126_s28 = sld [smem:[#allocation12_spill]] }
 0x363   : > { %s11127_s9 = smov %s10019_s10  ;;  %s11128_s10 = smov %s10023_s11 }
 0x364   : > { %s11129_s11 = smov %s10173_s7  ;;  %s11130_s12 = smov %s10031_s13 }
 0x365   : > { %s11131_s13 = smov %s10035_s14  ;;  %s11132_s14 = smov %s10176_s8 }
 0x366   : > { %s11133_s15 = smov %s10047_s17  ;;  %s11134_s16 = smov %s10051_s18 }
 0x367   : > { %s11135_s17 = smov %s11125_s6  ;;  %20 = sbr.rel (!%p18_p10) target bundleno = 13 (0xd), region = 90 }
 0x368   : > { %s11136_s18 = smov %s11126_s28 }
 0x36e   :  { %4928 = vsyncpa [#allocation3], 1 }
 0x36f   :  { %4930 = vsyncpa [#allocation3 + $0x1], 1 }
 0x370   :  { %4931 = vsyncpa [#allocation6], 1 }
 0x371   :  { %4933 = vsyncpa [#allocation6 + $0x1], 1 }
 0x372   :  { %4934 = vsyncpa [#allocation4], 1 }
 0x373   :  { %4936 = vsyncpa [#allocation4 + $0x1], 1 }

</bundles_post_ra>
